<compile_context>
chip_gen: v5e
topology: v5e:2x2
jax: 0.10.0
libtpu: 0.0.40
codegen_flags: <defaults>
</compile_context>

<pallas_src>
import functools

import numpy as np
import jax
import jax.numpy as jnp
from jax import lax
from jax.experimental import pallas as pl
from jax.experimental.pallas import tpu as pltpu


_VMEM_LIMIT = 32 * 1024 * 1024   # explicit scoped VMEM (safe on v5e/v6e/v7x);
                                 # on v6e with tm>=1024 this could be raised to 64 MiB
_MAX_ROW_TILE = 512              # row tile cap: keeps double-buffered tiles well
                                 # under v7x's 64 MiB VMEM; v6e could use 1024


def _round_up(n, m):
    return (n + m - 1) // m * m


def _row_tiling(n, max_tile=_MAX_ROW_TILE):
    """Pick (row_tile, padded_rows).

    row_tile is a multiple of 16 (bf16 sublane packing).  The tile count is the
    minimum that keeps a tile <= max_tile; the tile is then shrunk to just
    cover n (rounded up to 16), so padding waste is bounded by < 16 rows per
    tile instead of padding n up to a multiple of max_tile."""
    nt = -(-n // max_tile)                          # ceil(n / max_tile)
    t = min(_round_up(-(-n // nt), 16), max_tile)   # ceil(n / nt) -> x16
    return t, t * nt


# ----------------------------- Pallas kernels ------------------------------

def _branch_kernel(x_ref, w1_ref, scale_ref, shift_ref, w2_ref, b2_ref,
                   o_ref, ps_ref, *, valid_rows, tm, padded):
    # fc1 (bf16 MXU, f32 acc) -> BN(eval) scale/shift (f32) -> ReLU -> fc2 (+bias)
    y = jnp.dot(x_ref[0], w1_ref[...], preferred_element_type=jnp.float32)
    y = jnp.maximum(y * scale_ref[...] + shift_ref[...], 0.0)
    y = jnp.dot(y.astype(w2_ref.dtype), w2_ref[...],
                preferred_element_type=jnp.float32) + b2_ref[...]
    o_ref[0] = y.astype(o_ref.dtype)

    # per-tile partial sums (over rows) for the global-average-pool, so the
    # reweight MLP never re-reads h_out / w_out from HBM.
    if padded:  # static: only true when rows were zero-padded to a tile multiple
        row = pl.program_id(1) * tm + lax.broadcasted_iota(jnp.int32, (tm, 1), 0)
        y = jnp.where(row < valid_rows, y, 0.0)
    ps = jnp.sum(y, axis=0, keepdims=True)                       # (1, Cp) f32
    ps_ref[0, 0] = jnp.broadcast_to(ps, (8, ps.shape[-1]))


def branch_mlp(xg, w1, scale, shift, w2, b2):
    """Fused mlp_{h,w}1 -> BN(eval) -> ReLU -> mlp_{h,w}2 on grouped rows.

    xg: (B, R, Cp) bf16; w1: (Cp, Chp) bf16; scale/shift: (1, Chp) f32;
    w2: (Chp, Cp) bf16; b2: (1, Cp) f32.
    Returns y: (B, R, Cp) bf16 and pooled sums over rows: (B, Cp) f32."""
    B, R, Cp = xg.shape
    Chp = w1.shape[1]
    tm, r_pad = _row_tiling(R)
    if r_pad != R:
        xg = jnp.pad(xg, ((0, 0), (0, r_pad - R), (0, 0)))
    nt = r_pad // tm

    flops = 4 * B * r_pad * Cp * Chp
    bytes_accessed = (2 * B * r_pad * Cp * xg.dtype.itemsize      # x in + y out
                      + 2 * Cp * Chp * w1.dtype.itemsize          # w1 + w2
                      + (2 * Chp + 2 * Cp) * 4                    # scale/shift/bias
                      + B * nt * 8 * Cp * 4)                      # pooled sums

    y, pooled = pl.pallas_call(
        functools.partial(_branch_kernel, valid_rows=R, tm=tm,
                          padded=(r_pad != R)),
        out_shape=(jax.ShapeDtypeStruct((B, r_pad, Cp), xg.dtype),
                   jax.ShapeDtypeStruct((B, nt, 8, Cp), jnp.float32)),
        grid_spec=pltpu.PrefetchScalarGridSpec(
            num_scalar_prefetch=0,
            grid=(B, nt),
            in_specs=[
                pl.BlockSpec((1, tm, Cp), lambda b, i: (b, i, 0)),
                pl.BlockSpec((Cp, Chp), lambda b, i: (0, 0)),
                pl.BlockSpec((1, Chp), lambda b, i: (0, 0)),
                pl.BlockSpec((1, Chp), lambda b, i: (0, 0)),
                pl.BlockSpec((Chp, Cp), lambda b, i: (0, 0)),
                pl.BlockSpec((1, Cp), lambda b, i: (0, 0)),
            ],
            out_specs=(
                pl.BlockSpec((1, tm, Cp), lambda b, i: (b, i, 0)),
                pl.BlockSpec((1, 1, 8, Cp), lambda b, i: (b, i, 0, 0)),
            ),
        ),
        compiler_params=pltpu.CompilerParams(
            dimension_semantics=("parallel", "parallel"),
            vmem_limit_bytes=_VMEM_LIMIT),
        cost_estimate=pl.CostEstimate(flops=flops, transcendentals=0,
                                      bytes_accessed=bytes_accessed),
    )(xg, w1, scale, shift, w2, b2)

    if r_pad != R:
        y = y[:, :R]
    pool = pooled[:, :, 0, :].sum(axis=1)                         # (B, Cp) f32
    return y, pool


def _combine_proj_kernel(h_ref, w_ref, x_ref, a_ref, cw_ref, cb_ref,
                         pw_ref, pb_ref, o_ref):
    a = a_ref[0]                                       # (8, C) f32; rows 0..2 used
    # mlp_c fused: c = x @ c_w + c_b   (bf16 MXU, f32 acc)
    c = jnp.dot(x_ref[0], cw_ref[...], preferred_element_type=jnp.float32) + cb_ref[...]
    comb = (h_ref[0].astype(jnp.float32) * a[0:1]
            + w_ref[0].astype(jnp.float32) * a[1:2]
            + c * a[2:3])
    y = jnp.dot(comb.astype(pw_ref.dtype), pw_ref[...],
                preferred_element_type=jnp.float32) + pb_ref[...]
    o_ref[0] = y.astype(o_ref.dtype)


def combine_proj(h3, w3, x3, a_b8c, c_w, c_b, p_w, p_b):
    """x = h*a0 + w*a1 + (x@c_w+c_b)*a2 followed by the `proj` 1x1 conv.

    h3/w3/x3: (B, HW, C) bf16; a_b8c: (B, 8, C) f32 (rows 0..2 = a0,a1,a2);
    c_w/p_w: (C, C) bf16; c_b/p_b: (1, C) f32.  Returns (B, HW, C) f32."""
    B, HW, C = h3.shape
    tm, r_pad = _row_tiling(HW)
    if r_pad != HW:
        pad = ((0, 0), (0, r_pad - HW), (0, 0))
        h3, w3, x3 = jnp.pad(h3, pad), jnp.pad(w3, pad), jnp.pad(x3, pad)
    nt = r_pad // tm

    flops = 4 * B * r_pad * C * C
    bytes_accessed = (3 * B * r_pad * C * h3.dtype.itemsize       # h, w, x in
                      + B * r_pad * C * 4                         # out f32
                      + 2 * C * C * c_w.dtype.itemsize            # c_w + proj_w
                      + B * 8 * C * 4 + 2 * C * 4)                # a + biases

    out = pl.pallas_call(
        _combine_proj_kernel,
        out_shape=jax.ShapeDtypeStruct((B, r_pad, C), jnp.float32),
        grid_spec=pltpu.PrefetchScalarGridSpec(
            num_scalar_prefetch=0,
            grid=(B, nt),
            in_specs=[
                pl.BlockSpec((1, tm, C), lambda b, i: (b, i, 0)),
                pl.BlockSpec((1, tm, C), lambda b, i: (b, i, 0)),
                pl.BlockSpec((1, tm, C), lambda b, i: (b, i, 0)),
                pl.BlockSpec((1, 8, C), lambda b, i: (b, 0, 0)),
                pl.BlockSpec((C, C), lambda b, i: (0, 0)),
                pl.BlockSpec((1, C), lambda b, i: (0, 0)),
                pl.BlockSpec((C, C), lambda b, i: (0, 0)),
                pl.BlockSpec((1, C), lambda b, i: (0, 0)),
            ],
            out_specs=pl.BlockSpec((1, tm, C), lambda b, i: (b, i, 0)),
        ),
        compiler_params=pltpu.CompilerParams(
            dimension_semantics=("parallel", "parallel"),
            vmem_limit_bytes=_VMEM_LIMIT),
        cost_estimate=pl.CostEstimate(flops=flops, transcendentals=0,
                                      bytes_accessed=bytes_accessed),
    )(h3, w3, x3, a_b8c, c_w, c_b, p_w, p_b)

    if r_pad != HW:
        out = out[:, :HW]
    return out


# ------------------------- shared padding / regroup -------------------------

def _shift_and_pad(x, axis, step, pad, step_pad_mode, pixel_pad_mode):
    """NHWC x: apply the circular/zero `step` shift and the pixel padding along
    `axis` (1 = rows for the h-branch, 2 = cols for the w-branch)."""
    n = x.shape[axis]
    if step:
        if step_pad_mode == "c":
            x = jnp.roll(x, step, axis=axis)
        elif step_pad_mode == "0":
            zeros = jnp.zeros_like(lax.slice_in_dim(x, 0, step, axis=axis))
            x = jnp.concatenate(
                [zeros, lax.slice_in_dim(x, 0, n - step, axis=axis)], axis=axis)
        else:
            raise NotImplementedError("Invalid pad mode.")
    if pad:
        if pixel_pad_mode == "c":
            tail = lax.slice_in_dim(x, 0, pad, axis=axis)
        elif pixel_pad_mode == "0":
            tail = jnp.zeros_like(lax.slice_in_dim(x, 0, pad, axis=axis))
        elif pixel_pad_mode == "replicate":
            tail = jnp.repeat(lax.slice_in_dim(x, n - 1, n, axis=axis), pad, axis=axis)
        else:
            raise NotImplementedError("Invalid pad mode.")
        x = jnp.concatenate([x, tail], axis=axis)
    return x


def _group_rows(h, p):
    """(B, Hp, W, C) -> (B, (Hp//p)*W, C*p), grouped channel index = c*p + q."""
    B, Hp, W, C = h.shape
    return (h.reshape(B, Hp // p, p, W, C)
              .transpose(0, 1, 3, 4, 2)
              .reshape(B, (Hp // p) * W, C * p))


def _ungroup_rows(y, B, Hp, W, C, p):
    return (y.reshape(B, Hp // p, W, C, p)
              .transpose(0, 1, 4, 2, 3)
              .reshape(B, Hp, W, C))


def _group_cols(w, p):
    B, H, Wp, C = w.shape
    return (w.reshape(B, H, Wp // p, p, C)
              .transpose(0, 1, 2, 4, 3)
              .reshape(B, H * (Wp // p), C * p))


def _ungroup_cols(y, B, H, Wp, C, p):
    return (y.reshape(B, H, Wp // p, C, p)
              .transpose(0, 1, 2, 4, 3)
              .reshape(B, H, Wp, C))


# ------------------------------ HireMLP forward -----------------------------

def hire_mlp_forward(x_nchw, params, *, pixel=2, step=1,
                     step_pad_mode="c", pixel_pad_mode="c"):
    """HireMLP token-mixing block forward (inference).  NCHW in / NCHW out."""
    B, C, H, W = x_nchw.shape
    p = pixel
    Cp = C * p
    Ch = params["h1_w"].shape[1]
    Chp = _round_up(Ch, 128)            # lane-dense hidden dim (exact zero-pad)

    x = jnp.transpose(x_nchw, (0, 2, 3, 1)).astype(jnp.float32)   # NHWC f32
    pad_h = (p - H % p) % p
    pad_w = (p - W % p) % p
    Hp, Wp = H + pad_h, W + pad_w

    h = _shift_and_pad(x, 1, step, pad_h, step_pad_mode, pixel_pad_mode)
    w = _shift_and_pad(x, 2, step, pad_w, step_pad_mode, pixel_pad_mode)

    # regroup in bf16 so the XLA-side transposes move half the bytes
    hg = _group_rows(h.astype(jnp.bfloat16), p)                   # (B, Rh, Cp)
    wg = _group_cols(w.astype(jnp.bfloat16), p)                   # (B, Rw, Cp)
    # TODO(synk): fold the pixel regroup/ungroup into the branch-MLP BlockSpecs
    # (strided row gather + in-kernel relayout) to remove these transpose passes.

    def pad_hidden(w1, scale, shift, w2):
        return (jnp.pad(w1, ((0, 0), (0, Chp - Ch))).astype(jnp.bfloat16),
                jnp.pad(scale, (0, Chp - Ch)).reshape(1, Chp).astype(jnp.float32),
                jnp.pad(shift, (0, Chp - Ch)).reshape(1, Chp).astype(jnp.float32),
                jnp.pad(w2, ((0, Chp - Ch), (0, 0))).astype(jnp.bfloat16))

    h1, hsc, hsh, h2 = pad_hidden(params["h1_w"], params["h_scale"],
                                  params["h_shift"], params["h2_w"])
    w1, wsc, wsh, w2 = pad_hidden(params["w1_w"], params["w_scale"],
                                  params["w_shift"], params["w2_w"])

    h_out_g, h_pool = branch_mlp(
        hg, h1, hsc, hsh, h2, params["h2_b"].reshape(1, Cp).astype(jnp.float32))
    w_out_g, w_pool = branch_mlp(
        wg, w1, wsc, wsh, w2, params["w2_b"].reshape(1, Cp).astype(jnp.float32))

    h_out = _ungroup_rows(h_out_g, B, Hp, W, C, p)[:, :H]
    w_out = _ungroup_cols(w_out_g, B, H, Wp, C, p)[:, :, :W]
    if step and step_pad_mode == "c":
        h_out = jnp.roll(h_out, -step, axis=1)
        w_out = jnp.roll(w_out, -step, axis=2)

    # --- reweight MLP on (B, C) global-average-pooled features (plain JAX) ---
    c_w = params["c_w"].astype(jnp.float32)
    c_b = params["c_b"].astype(jnp.float32)
    mean_c = x.mean(axis=(1, 2)) @ c_w + c_b      # mlp_c commutes with the mean
    if pad_h == 0 and pad_w == 0:
        # kernel-side pooled sums (grouped channel c*p+q): no extra HBM pass
        mean_h = h_pool.reshape(B, C, p).sum(-1) / (H * W)
        mean_w = w_pool.reshape(B, C, p).sum(-1) / (H * W)
    else:
        # padded rows/cols are cropped before the pool -> recompute from outputs
        mean_h = h_out.astype(jnp.float32).mean(axis=(1, 2))
        mean_w = w_out.astype(jnp.float32).mean(axis=(1, 2))
    a = mean_h + mean_w + mean_c
    a = a @ params["rw1_w"] + params["rw1_b"]
    a = jax.nn.gelu(a, approximate=False)                 # nn.GELU (exact)
    a = a @ params["rw2_w"] + params["rw2_b"]             # (B, 3C)
    a = jax.nn.softmax(a.reshape(B, C, 3).transpose(2, 0, 1), axis=0)   # (3, B, C)
    a_b8c = jnp.pad(jnp.transpose(a, (1, 0, 2)),
                    ((0, 0), (0, 5), (0, 0))).astype(jnp.float32)       # (B, 8, C)

    out = combine_proj(h_out.reshape(B, H * W, C),
                       w_out.reshape(B, H * W, C),
                       x.astype(jnp.bfloat16).reshape(B, H * W, C),
                       a_b8c,
                       params["c_w"].astype(jnp.bfloat16), c_b.reshape(1, C),
                       params["proj_w"].astype(jnp.bfloat16),
                       params["proj_b"].reshape(1, C).astype(jnp.float32))
    return out.reshape(B, H, W, C).transpose(0, 3, 1, 2)                # NCHW


# ---------------------- pure-JAX (f32) reference forward --------------------

def hire_mlp_forward_ref(x_nchw, params, *, pixel=2, step=1,
                         step_pad_mode="c", pixel_pad_mode="c"):
    B, C, H, W = x_nchw.shape
    p = pixel
    x = jnp.transpose(x_nchw, (0, 2, 3, 1)).astype(jnp.float32)
    pad_h = (p - H % p) % p
    pad_w = (p - W % p) % p
    Hp, Wp = H + pad_h, W + pad_w
    h = _shift_and_pad(x, 1, step, pad_h, step_pad_mode, pixel_pad_mode)
    w = _shift_and_pad(x, 2, step, pad_w, step_pad_mode, pixel_pad_mode)
    hg = _group_rows(h, p)
    wg = _group_cols(w, p)

    def branch(xg, w1, scale, shift, w2, b2):
        y = jnp.dot(xg, w1, precision="highest") * scale + shift
        y = jnp.maximum(y, 0.0)
        return jnp.dot(y, w2, precision="highest") + b2

    h_out = branch(hg, params["h1_w"], params["h_scale"], params["h_shift"],
                   params["h2_w"], params["h2_b"])
    w_out = branch(wg, params["w1_w"], params["w_scale"], params["w_shift"],
                   params["w2_w"], params["w2_b"])
    h_out = _ungroup_rows(h_out, B, Hp, W, C, p)[:, :H]
    w_out = _ungroup_cols(w_out, B, H, Wp, C, p)[:, :, :W]
    if step and step_pad_mode == "c":
        h_out = jnp.roll(h_out, -step, axis=1)
        w_out = jnp.roll(w_out, -step, axis=2)
    c_out = jnp.dot(x, params["c_w"], precision="highest") + params["c_b"]
    a = (h_out + w_out + c_out).mean(axis=(1, 2))
    a = jnp.dot(a, params["rw1_w"], precision="highest") + params["rw1_b"]
    a = jax.nn.gelu(a, approximate=False)
    a = jnp.dot(a, params["rw2_w"], precision="highest") + params["rw2_b"]
    a = jax.nn.softmax(a.reshape(B, C, 3).transpose(2, 0, 1), axis=0)
    xo = (h_out * a[0][:, None, None, :] + w_out * a[1][:, None, None, :]
          + c_out * a[2][:, None, None, :])
    out = jnp.dot(xo, params["proj_w"], precision="highest") + params["proj_b"]
    return out.transpose(0, 3, 1, 2)


# ------------------------------ parameter init ------------------------------

def make_params(key, C, pixel):
    """Deterministic synthetic parameters.  Conv2d(Cin, Cout, 1) weights are
    stored pre-transposed as (Cin, Cout) matmul matrices.  BN (eval mode) is
    folded to an exact per-channel (scale, shift)."""
    Cp, Ch, Cq = C * pixel, C // 2, C // 4
    eps = 1e-5
    ks = jax.random.split(key, 24)

    def rnd(k, shape, scale=0.05):
        return jax.random.normal(k, shape, jnp.float32) * scale

    def bn(k0, k1, k2, k3, n):
        gamma = 1.0 + 0.1 * jax.random.normal(k0, (n,), jnp.float32)
        beta = 0.1 * jax.random.normal(k1, (n,), jnp.float32)
        rm = 0.1 * jax.random.normal(k2, (n,), jnp.float32)
        rv = 1.0 + 0.1 * jax.random.uniform(k3, (n,), jnp.float32)
        scale = gamma / jnp.sqrt(rv + eps)
        shift = beta - rm * scale
        return scale, shift

    h_scale, h_shift = bn(ks[8], ks[9], ks[10], ks[11], Ch)
    w_scale, w_shift = bn(ks[12], ks[13], ks[14], ks[15], Ch)

    return dict(
        h1_w=rnd(ks[0], (Cp, Ch)), h2_w=rnd(ks[1], (Ch, Cp)), h2_b=rnd(ks[2], (Cp,)),
        w1_w=rnd(ks[3], (Cp, Ch)), w2_w=rnd(ks[4], (Ch, Cp)), w2_b=rnd(ks[5], (Cp,)),
        c_w=rnd(ks[6], (C, C)), c_b=rnd(ks[7], (C,)),
        h_scale=h_scale, h_shift=h_shift, w_scale=w_scale, w_shift=w_shift,
        rw1_w=rnd(ks[16], (C, Cq)), rw1_b=rnd(ks[17], (Cq,)),
        rw2_w=rnd(ks[18], (Cq, 3 * C)), rw2_b=rnd(ks[19], (3 * C,)),
        proj_w=rnd(ks[20], (C, C)), proj_b=rnd(ks[21], (C,)),
    )


if __name__ == "__main__":
    def run_case(case_idx, B, C, H, W, pixel, step):
        key = jax.random.fold_in(jax.random.PRNGKey(0), case_idx)
        kx, kp = jax.random.split(key)
        x = jax.random.normal(kx, (B, C, H, W), jnp.float32)
        params = make_params(kp, C, pixel)

        fwd = jax.jit(functools.partial(hire_mlp_forward, pixel=pixel, step=step))
        ref_fn = jax.jit(functools.partial(hire_mlp_forward_ref, pixel=pixel, step=step))

        out = jax.block_until_ready(fwd(x, params))
        assert out.shape == (B, C, H, W)
        ref = jax.block_until_ready(ref_fn(x, params))
        np.testing.assert_allclose(np.asarray(out), np.asarray(ref),
                                   rtol=2e-2, atol=2e-2)

    # main case: tile-divisible rows, kernel-side pooled GAP path
    run_case(0, B=2, C=32, H=16, W=16, pixel=2, step=1)
    # rows not divisible by the row tile -> exercises row padding + masked pooling
    run_case(1, B=1, C=32, H=34, W=34, pixel=2, step=1)
    # odd spatial dims -> pixel (circular) padding + JAX-side pooled fallback
    run_case(2, B=2, C=32, H=15, W=15, pixel=2, step=1)

    print("KERNEL_OK")
</pallas_src>

<mosaic_0001>
module attributes {stable_mosaic.version = 11 : i64} {
  func.func @_branch_kernel(%arg0: i32, %arg1: i32, %arg2: memref<1x128x64xbf16, #tpu.memory_space<vmem>>, %arg3: memref<64x128xbf16, #tpu.memory_space<vmem>>, %arg4: memref<1x128xf32, #tpu.memory_space<vmem>>, %arg5: memref<1x128xf32, #tpu.memory_space<vmem>>, %arg6: memref<128x64xbf16, #tpu.memory_space<vmem>>, %arg7: memref<1x64xf32, #tpu.memory_space<vmem>>, %arg8: memref<1x128x64xbf16, #tpu.memory_space<vmem>>, %arg9: memref<1x1x8x64xf32, #tpu.memory_space<vmem>>) attributes {dimension_semantics = [#tpu.dimension_semantics<parallel>, #tpu.dimension_semantics<parallel>], iteration_bounds = array<i64: 2, 1>, scalar_prefetch = 0 : i64, scratch_operands = 0 : i64, tpu.core_type = #tpu.core_type<tc>, window_params = [{transform_indices = @transform_0, window_bounds = array<i64: 1, 128, 64>}, {pipeline_mode = #tpu.pipeline_mode<synchronous>, transform_indices = @transform_1, window_bounds = array<i64: 64, 128>}, {pipeline_mode = #tpu.pipeline_mode<synchronous>, transform_indices = @transform_2, window_bounds = array<i64: 1, 128>}, {pipeline_mode = #tpu.pipeline_mode<synchronous>, transform_indices = @transform_3, window_bounds = array<i64: 1, 128>}, {pipeline_mode = #tpu.pipeline_mode<synchronous>, transform_indices = @transform_4, window_bounds = array<i64: 128, 64>}, {pipeline_mode = #tpu.pipeline_mode<synchronous>, transform_indices = @transform_5, window_bounds = array<i64: 1, 64>}, {transform_indices = @transform_6, window_bounds = array<i64: 1, 128, 64>}, {transform_indices = @transform_7, window_bounds = array<i64: 1, 1, 8, 64>}]} {
    %c0 = arith.constant 0 : index
    %c0_0 = arith.constant 0 : index
    %c0_1 = arith.constant 0 : index
    %0 = vector.load %arg2[%c0, %c0_0, %c0_1] : memref<1x128x64xbf16, #tpu.memory_space<vmem>>, vector<1x128x64xbf16>
    %1 = vector.shape_cast %0 : vector<1x128x64xbf16> to vector<128x64xbf16>
    %c0_2 = arith.constant 0 : index
    %c0_3 = arith.constant 0 : index
    %2 = vector.load %arg3[%c0_2, %c0_3] : memref<64x128xbf16, #tpu.memory_space<vmem>>, vector<64x128xbf16>
    %cst = arith.constant dense<0.000000e+00> : vector<128x128xf32>
    %3 = tpu.matmul %1, %2, %cst {dimension_numbers = #tpu.dot_dimension_numbers<[1], [0], [0], [1], [0, 0, 1, 1], [], []>} : vector<128x64xbf16>, vector<64x128xbf16>, vector<128x128xf32> -> vector<128x128xf32>
    %c0_4 = arith.constant 0 : index
    %c0_5 = arith.constant 0 : index
    %4 = vector.load %arg4[%c0_4, %c0_5] : memref<1x128xf32, #tpu.memory_space<vmem>>, vector<1x128xf32>
    %5 = vector.broadcast %4 : vector<1x128xf32> to vector<128x128xf32>
    %6 = arith.mulf %3, %5 : vector<128x128xf32>
    %c0_6 = arith.constant 0 : index
    %c0_7 = arith.constant 0 : index
    %7 = vector.load %arg5[%c0_6, %c0_7] : memref<1x128xf32, #tpu.memory_space<vmem>>, vector<1x128xf32>
    %8 = vector.broadcast %7 : vector<1x128xf32> to vector<128x128xf32>
    %9 = arith.addf %6, %8 : vector<128x128xf32>
    %cst_8 = arith.constant 0.000000e+00 : f32
    %10 = vector.broadcast %cst_8 : f32 to vector<128x128xf32>
    %11 = arith.maximumf %9, %10 : vector<128x128xf32>
    %12 = arith.truncf %11 : vector<128x128xf32> to vector<128x128xbf16>
    %c0_9 = arith.constant 0 : index
    %c0_10 = arith.constant 0 : index
    %13 = vector.load %arg6[%c0_9, %c0_10] : memref<128x64xbf16, #tpu.memory_space<vmem>>, vector<128x64xbf16>
    %cst_11 = arith.constant dense<0.000000e+00> : vector<128x64xf32>
    %14 = tpu.matmul %12, %13, %cst_11 {dimension_numbers = #tpu.dot_dimension_numbers<[1], [0], [0], [1], [0, 0, 1, 1], [], []>} : vector<128x128xbf16>, vector<128x64xbf16>, vector<128x64xf32> -> vector<128x64xf32>
    %c0_12 = arith.constant 0 : index
    %c0_13 = arith.constant 0 : index
    %15 = vector.load %arg7[%c0_12, %c0_13] : memref<1x64xf32, #tpu.memory_space<vmem>>, vector<1x64xf32>
    %16 = vector.broadcast %15 : vector<1x64xf32> to vector<128x64xf32>
    %17 = arith.addf %14, %16 : vector<128x64xf32>
    %18 = arith.truncf %17 : vector<128x64xf32> to vector<128x64xbf16>
    %c0_14 = arith.constant 0 : index
    %c0_15 = arith.constant 0 : index
    %c0_16 = arith.constant 0 : index
    %19 = vector.load %arg8[%c0_14, %c0_15, %c0_16] : memref<1x128x64xbf16, #tpu.memory_space<vmem>>, vector<1x128x64xbf16>
    %20 = vector.shape_cast %19 : vector<1x128x64xbf16> to vector<128x64xbf16>
    %21 = vector.shape_cast %18 : vector<128x64xbf16> to vector<1x128x64xbf16>
    tpu.vector_store %arg8[%c0_14, %c0_15, %c0_16], %21 {strides = array<i32>} : memref<1x128x64xbf16, #tpu.memory_space<vmem>>, vector<1x128x64xbf16>,
    %cst_17 = arith.constant dense<0.000000e+00> : vector<64xf32>
    %22 = vector.multi_reduction <add>, %17, %cst_17 [0] : vector<128x64xf32> to vector<64xf32>
    %23 = vector.shape_cast %22 : vector<64xf32> to vector<1x64xf32>
    %24 = vector.shape_cast %23 : vector<1x64xf32> to vector<1x64xf32>
    %25 = vector.broadcast %24 : vector<1x64xf32> to vector<8x64xf32>
    %c0_18 = arith.constant 0 : index
    %c0_19 = arith.constant 0 : index
    %c0_20 = arith.constant 0 : index
    %c0_21 = arith.constant 0 : index
    %26 = vector.load %arg9[%c0_18, %c0_19, %c0_20, %c0_21] : memref<1x1x8x64xf32, #tpu.memory_space<vmem>>, vector<1x1x8x64xf32>
    %27 = vector.shape_cast %26 : vector<1x1x8x64xf32> to vector<8x64xf32>
    %28 = vector.shape_cast %25 : vector<8x64xf32> to vector<1x1x8x64xf32>
    tpu.vector_store %arg9[%c0_18, %c0_19, %c0_20, %c0_21], %28 {strides = array<i32>} : memref<1x1x8x64xf32, #tpu.memory_space<vmem>>, vector<1x1x8x64xf32>,
    return
  }
  func.func @transform_0(%arg0: i32, %arg1: i32) -> (i32, i32, i32) {
    %c0_i32 = arith.constant 0 : i32
    %c0_i32_0 = arith.constant 0 : i32
    return %arg0, %arg1, %c0_i32 : i32, i32, i32
  }
  func.func @transform_1(%arg0: i32, %arg1: i32) -> (i32, i32) {
    %c0_i32 = arith.constant 0 : i32
    %c0_i32_0 = arith.constant 0 : i32
    %c0_i32_1 = arith.constant 0 : i32
    return %c0_i32, %c0_i32_0 : i32, i32
  }
  func.func @transform_2(%arg0: i32, %arg1: i32) -> (i32, i32) {
    %c0_i32 = arith.constant 0 : i32
    %c0_i32_0 = arith.constant 0 : i32
    %c0_i32_1 = arith.constant 0 : i32
    return %c0_i32, %c0_i32_0 : i32, i32
  }
  func.func @transform_3(%arg0: i32, %arg1: i32) -> (i32, i32) {
    %c0_i32 = arith.constant 0 : i32
    %c0_i32_0 = arith.constant 0 : i32
    %c0_i32_1 = arith.constant 0 : i32
    return %c0_i32, %c0_i32_0 : i32, i32
  }
  func.func @transform_4(%arg0: i32, %arg1: i32) -> (i32, i32) {
    %c0_i32 = arith.constant 0 : i32
    %c0_i32_0 = arith.constant 0 : i32
    %c0_i32_1 = arith.constant 0 : i32
    return %c0_i32, %c0_i32_0 : i32, i32
  }
  func.func @transform_5(%arg0: i32, %arg1: i32) -> (i32, i32) {
    %c0_i32 = arith.constant 0 : i32
    %c0_i32_0 = arith.constant 0 : i32
    %c0_i32_1 = arith.constant 0 : i32
    return %c0_i32, %c0_i32_0 : i32, i32
  }
  func.func @transform_6(%arg0: i32, %arg1: i32) -> (i32, i32, i32) {
    %c0_i32 = arith.constant 0 : i32
    %c0_i32_0 = arith.constant 0 : i32
    return %arg0, %arg1, %c0_i32 : i32, i32, i32
  }
  func.func @transform_7(%arg0: i32, %arg1: i32) -> (i32, i32, i32, i32) {
    %c0_i32 = arith.constant 0 : i32
    %c0_i32_0 = arith.constant 0 : i32
    %c0_i32_1 = arith.constant 0 : i32
    return %arg0, %arg1, %c0_i32, %c0_i32_0 : i32, i32, i32, i32
  }
}

module attributes {stable_mosaic.version = 11 : i64} {
  func.func @_combine_proj_kernel(%arg0: i32, %arg1: i32, %arg2: memref<1x256x32xbf16, #tpu.memory_space<vmem>>, %arg3: memref<1x256x32xbf16, #tpu.memory_space<vmem>>, %arg4: memref<1x256x32xbf16, #tpu.memory_space<vmem>>, %arg5: memref<1x8x32xf32, #tpu.memory_space<vmem>>, %arg6: memref<32x32xbf16, #tpu.memory_space<vmem>>, %arg7: memref<1x32xf32, #tpu.memory_space<vmem>>, %arg8: memref<32x32xbf16, #tpu.memory_space<vmem>>, %arg9: memref<1x32xf32, #tpu.memory_space<vmem>>, %arg10: memref<1x256x32xf32, #tpu.memory_space<vmem>>) attributes {dimension_semantics = [#tpu.dimension_semantics<parallel>, #tpu.dimension_semantics<parallel>], iteration_bounds = array<i64: 2, 1>, scalar_prefetch = 0 : i64, scratch_operands = 0 : i64, tpu.core_type = #tpu.core_type<tc>, window_params = [{transform_indices = @transform_0, window_bounds = array<i64: 1, 256, 32>}, {transform_indices = @transform_1, window_bounds = array<i64: 1, 256, 32>}, {transform_indices = @transform_2, window_bounds = array<i64: 1, 256, 32>}, {transform_indices = @transform_3, window_bounds = array<i64: 1, 8, 32>}, {pipeline_mode = #tpu.pipeline_mode<synchronous>, transform_indices = @transform_4, window_bounds = array<i64: 32, 32>}, {pipeline_mode = #tpu.pipeline_mode<synchronous>, transform_indices = @transform_5, window_bounds = array<i64: 1, 32>}, {pipeline_mode = #tpu.pipeline_mode<synchronous>, transform_indices = @transform_6, window_bounds = array<i64: 32, 32>}, {pipeline_mode = #tpu.pipeline_mode<synchronous>, transform_indices = @transform_7, window_bounds = array<i64: 1, 32>}, {transform_indices = @transform_8, window_bounds = array<i64: 1, 256, 32>}]} {
    %c0 = arith.constant 0 : index
    %c0_0 = arith.constant 0 : index
    %c0_1 = arith.constant 0 : index
    %0 = vector.load %arg5[%c0, %c0_0, %c0_1] : memref<1x8x32xf32, #tpu.memory_space<vmem>>, vector<1x8x32xf32>
    %1 = vector.shape_cast %0 : vector<1x8x32xf32> to vector<8x32xf32>
    %c0_2 = arith.constant 0 : index
    %c0_3 = arith.constant 0 : index
    %c0_4 = arith.constant 0 : index
    %2 = vector.load %arg4[%c0_2, %c0_3, %c0_4] : memref<1x256x32xbf16, #tpu.memory_space<vmem>>, vector<1x256x32xbf16>
    %3 = vector.shape_cast %2 : vector<1x256x32xbf16> to vector<256x32xbf16>
    %c0_5 = arith.constant 0 : index
    %c0_6 = arith.constant 0 : index
    %4 = vector.load %arg6[%c0_5, %c0_6] : memref<32x32xbf16, #tpu.memory_space<vmem>>, vector<32x32xbf16>
    %cst = arith.constant dense<0.000000e+00> : vector<256x32xf32>
    %5 = tpu.matmul %3, %4, %cst {dimension_numbers = #tpu.dot_dimension_numbers<[1], [0], [0], [1], [0, 0, 1, 1], [], []>} : vector<256x32xbf16>, vector<32x32xbf16>, vector<256x32xf32> -> vector<256x32xf32>
    %c0_7 = arith.constant 0 : index
    %c0_8 = arith.constant 0 : index
    %6 = vector.load %arg7[%c0_7, %c0_8] : memref<1x32xf32, #tpu.memory_space<vmem>>, vector<1x32xf32>
    %7 = vector.broadcast %6 : vector<1x32xf32> to vector<256x32xf32>
    %8 = arith.addf %5, %7 : vector<256x32xf32>
    %c0_9 = arith.constant 0 : index
    %c0_10 = arith.constant 0 : index
    %c0_11 = arith.constant 0 : index
    %9 = vector.load %arg2[%c0_9, %c0_10, %c0_11] : memref<1x256x32xbf16, #tpu.memory_space<vmem>>, vector<1x256x32xbf16>
    %10 = vector.shape_cast %9 : vector<1x256x32xbf16> to vector<256x32xbf16>
    %11 = arith.extf %10 : vector<256x32xbf16> to vector<256x32xf32>
    %12 = vector.extract_strided_slice %1 {offsets = [0, 0], sizes = [1, 32], strides = [1, 1]} : vector<8x32xf32> to vector<1x32xf32>
    %13 = vector.broadcast %12 : vector<1x32xf32> to vector<256x32xf32>
    %14 = arith.mulf %11, %13 : vector<256x32xf32>
    %c0_12 = arith.constant 0 : index
    %c0_13 = arith.constant 0 : index
    %c0_14 = arith.constant 0 : index
    %15 = vector.load %arg3[%c0_12, %c0_13, %c0_14] : memref<1x256x32xbf16, #tpu.memory_space<vmem>>, vector<1x256x32xbf16>
    %16 = vector.shape_cast %15 : vector<1x256x32xbf16> to vector<256x32xbf16>
    %17 = arith.extf %16 : vector<256x32xbf16> to vector<256x32xf32>
    %18 = vector.extract_strided_slice %1 {offsets = [1, 0], sizes = [1, 32], strides = [1, 1]} : vector<8x32xf32> to vector<1x32xf32>
    %19 = vector.broadcast %18 : vector<1x32xf32> to vector<256x32xf32>
    %20 = arith.mulf %17, %19 : vector<256x32xf32>
    %21 = arith.addf %14, %20 : vector<256x32xf32>
    %22 = vector.extract_strided_slice %1 {offsets = [2, 0], sizes = [1, 32], strides = [1, 1]} : vector<8x32xf32> to vector<1x32xf32>
    %23 = vector.broadcast %22 : vector<1x32xf32> to vector<256x32xf32>
    %24 = arith.mulf %8, %23 : vector<256x32xf32>
    %25 = arith.addf %21, %24 : vector<256x32xf32>
    %26 = arith.truncf %25 : vector<256x32xf32> to vector<256x32xbf16>
    %c0_15 = arith.constant 0 : index
    %c0_16 = arith.constant 0 : index
    %27 = vector.load %arg8[%c0_15, %c0_16] : memref<32x32xbf16, #tpu.memory_space<vmem>>, vector<32x32xbf16>
    %cst_17 = arith.constant dense<0.000000e+00> : vector<256x32xf32>
    %28 = tpu.matmul %26, %27, %cst_17 {dimension_numbers = #tpu.dot_dimension_numbers<[1], [0], [0], [1], [0, 0, 1, 1], [], []>} : vector<256x32xbf16>, vector<32x32xbf16>, vector<256x32xf32> -> vector<256x32xf32>
    %c0_18 = arith.constant 0 : index
    %c0_19 = arith.constant 0 : index
    %29 = vector.load %arg9[%c0_18, %c0_19] : memref<1x32xf32, #tpu.memory_space<vmem>>, vector<1x32xf32>
    %30 = vector.broadcast %29 : vector<1x32xf32> to vector<256x32xf32>
    %31 = arith.addf %28, %30 : vector<256x32xf32>
    %c0_20 = arith.constant 0 : index
    %c0_21 = arith.constant 0 : index
    %c0_22 = arith.constant 0 : index
    %32 = vector.load %arg10[%c0_20, %c0_21, %c0_22] : memref<1x256x32xf32, #tpu.memory_space<vmem>>, vector<1x256x32xf32>
    %33 = vector.shape_cast %32 : vector<1x256x32xf32> to vector<256x32xf32>
    %34 = vector.shape_cast %31 : vector<256x32xf32> to vector<1x256x32xf32>
    tpu.vector_store %arg10[%c0_20, %c0_21, %c0_22], %34 {strides = array<i32>} : memref<1x256x32xf32, #tpu.memory_space<vmem>>, vector<1x256x32xf32>,
    return
  }
  func.func @transform_0(%arg0: i32, %arg1: i32) -> (i32, i32, i32) {
    %c0_i32 = arith.constant 0 : i32
    %c0_i32_0 = arith.constant 0 : i32
    return %arg0, %arg1, %c0_i32 : i32, i32, i32
  }
  func.func @transform_1(%arg0: i32, %arg1: i32) -> (i32, i32, i32) {
    %c0_i32 = arith.constant 0 : i32
    %c0_i32_0 = arith.constant 0 : i32
    return %arg0, %arg1, %c0_i32 : i32, i32, i32
  }
  func.func @transform_2(%arg0: i32, %arg1: i32) -> (i32, i32, i32) {
    %c0_i32 = arith.constant 0 : i32
    %c0_i32_0 = arith.constant 0 : i32
    return %arg0, %arg1, %c0_i32 : i32, i32, i32
  }
  func.func @transform_3(%arg0: i32, %arg1: i32) -> (i32, i32, i32) {
    %c0_i32 = arith.constant 0 : i32
    %c0_i32_0 = arith.constant 0 : i32
    %c0_i32_1 = arith.constant 0 : i32
    return %arg0, %c0_i32, %c0_i32_0 : i32, i32, i32
  }
  func.func @transform_4(%arg0: i32, %arg1: i32) -> (i32, i32) {
    %c0_i32 = arith.constant 0 : i32
    %c0_i32_0 = arith.constant 0 : i32
    %c0_i32_1 = arith.constant 0 : i32
    return %c0_i32, %c0_i32_0 : i32, i32
  }
  func.func @transform_5(%arg0: i32, %arg1: i32) -> (i32, i32) {
    %c0_i32 = arith.constant 0 : i32
    %c0_i32_0 = arith.constant 0 : i32
    %c0_i32_1 = arith.constant 0 : i32
    return %c0_i32, %c0_i32_0 : i32, i32
  }
  func.func @transform_6(%arg0: i32, %arg1: i32) -> (i32, i32) {
    %c0_i32 = arith.constant 0 : i32
    %c0_i32_0 = arith.constant 0 : i32
    %c0_i32_1 = arith.constant 0 : i32
    return %c0_i32, %c0_i32_0 : i32, i32
  }
  func.func @transform_7(%arg0: i32, %arg1: i32) -> (i32, i32) {
    %c0_i32 = arith.constant 0 : i32
    %c0_i32_0 = arith.constant 0 : i32
    %c0_i32_1 = arith.constant 0 : i32
    return %c0_i32, %c0_i32_0 : i32, i32
  }
  func.func @transform_8(%arg0: i32, %arg1: i32) -> (i32, i32, i32) {
    %c0_i32 = arith.constant 0 : i32
    %c0_i32_0 = arith.constant 0 : i32
    return %arg0, %arg1, %c0_i32 : i32, i32, i32
  }
}

</mosaic_0001>

<bundles_post_ra>
// kernel: hire_mlp_forward.4
= control target key start
LH: loop header
LB: loop body
LE: loop exit
PB: predicated region body
PF: predicated region fallthrough
CT: control target
= control target key end

     0   :  { %s1105_s24 = smov 0   ;;  %s1107_s25 = smov 0   ;;  %s1307_s0 = inlined_call_operand.vmem [shape: bf16[2,128,64], index: 0, kind: input, shape index: {}]   ;;  %s1308_s1 = inlined_call_operand.vmem [shape: bf16[64,128], index: 1, kind: input, shape index: {}]   ;;  %s1309_s2 = inlined_call_operand.vmem [shape: f32[1,128], index: 2, kind: input, shape index: {}]   ;;  %s1310_s3 = inlined_call_operand.vmem [shape: f32[1,128], index: 3, kind: input, shape index: {}]   ;;  %s1311_s4 = inlined_call_operand.vmem [shape: bf16[128,64], index: 4, kind: input, shape index: {}]   ;;  %s1312_s5 = inlined_call_operand.vmem [shape: f32[1,64], index: 5, kind: input, shape index: {}]   ;;  %s1313_s6 = inlined_call_operand.vmem [shape: bf16[2,128,64], index: 6, kind: output, shape index: {0}]   ;;  %s1314_s7 = inlined_call_operand.vmem [shape: f32[2,1,8,64], index: 7, kind: output, shape index: {1}]  }
   0x1   :  { %s1109_s26 = smov 0  }
   0x2 LB: > { %s30_s27 = sadd.s32 1, %s1059_s25  ;;  %p884_p0 = scmp.ge.s32.totalorder %s1063_s26, 1  ;;  %s1063_s26 = sphi %s1109_s26, %s18_s26   ;;  %s1059_s25 = sphi %s1107_s25, %s1316_s25   ;;  %s1055_s24 = sphi %s1105_s24, %s1315_s24  }
   0x3   : > { %p32_p1 = scmp.ge.s32.totalorder %s30_s27, 2  ;;  %p263_p2 = scmp.lt.s32.totalorder %s1063_s26, 3 }
   0x5   : > { %s1318_s27 = smov (%p32_p1, %s30_s27), 0  ;;  %p264_p3 = pnand %p884_p0, %p263_p2 }
   0x6   : > { %p311_p4 = scmp.lt.s32.totalorder (!%p264_p3), %s1055_s24, 1 }
   0x7   : > { %267 = sbr.rel (%p264_p3) target bundleno = 440 (0x1b8), region = 44 }
   0xc   : > { %v993_v0 = vld [vmem:[%s1308_s1 + $0x18] sm:$0xff]  ;;  %v992_v1 = vld [vmem:[%s1308_s1 + $0x10] sm:$0xff]  ;;  %s1320_s24 = smov (!%p311_p4, %s1055_s24), 1  ;;  %v991_v2 = vld [vmem:[%s1308_s1 + $0x8] sm:$0xff]  ;;  %vm426_vm0 = vcmask 523264   ;;  %vm697_vm1 = vcmask 519168  }
   0xd   : > { %455 = vmatpush.bf16.msra.mxu0 %v993_v0  ;;  %1002 = vmatpush.bf16.msra.mxu3 %v993_v0  ;;  %s980_s11 = sshll.u32 %s1320_s24, 6  ;;  %v990_v3 = vld [vmem:[%s1308_s1] sm:$0xff]  ;;  %v1001_v8 = vld [vmem:[%s1311_s4 + $0x38] sm:$0xff]  ;;  %v1000_v9 = vld [vmem:[%s1311_s4 + $0x30] sm:$0xff] }
   0xe   : > { %s318_s16 = scalar_lea.vmem %s1307_s0, %s980_s11  ;;  %632 = vmatpush.bf16.msra.mxu1 %v1001_v8  ;;  %1006 = vmatpush.bf16.msra.mxu2 %v1001_v8  ;;  %v999_v10 = vld [vmem:[%s1311_s4 + $0x28] sm:$0xff]  ;;  %v998_v12 = vld [vmem:[%s1311_s4 + $0x20] sm:$0xff]  ;;  %v997_v16 = vld [vmem:[%s1311_s4 + $0x18] sm:$0xff]  ;;  %s1228_s23 = scalar_lea.vmem %s1313_s6, %s980_s11 }
   0xf   : > { %v982_v4 = vld [vmem:[%s318_s16] sm:$0xff]  ;;  %v983_v5 = vld [vmem:[%s318_s16 + $0x8] sm:$0xff]  ;;  %v984_v6 = vld [vmem:[%s318_s16 + $0x10] sm:$0xff]  ;;  %s889_s11 = sshll.u32 %s1320_s24, 3 }
  0x10   : > { %v987_v7 = vld [vmem:[%s318_s16 + $0x28] sm:$0xff]  ;;  %v985_v11 = vld [vmem:[%s318_s16 + $0x18] sm:$0xff]  ;;  %v988_v13 = vld [vmem:[%s318_s16 + $0x30] sm:$0xff]  ;;  %s336_s30 = scalar_lea.vmem %s1314_s7, %s889_s11 }
  0x11   : > { %456 = vmatpush.bf16.msra.mxu0 %v992_v1  ;;  %1003 = vmatpush.bf16.msra.mxu3 %v992_v1  ;;  %v986_v14 = vld [vmem:[%s318_s16 + $0x20] sm:$0xff]  ;;  %v989_v15 = vld [vmem:[%s318_s16 + $0x38] sm:$0xff]  ;;  %v996_v17 = vld [vmem:[%s1311_s4 + $0x10] sm:$0xff] }
  0x12   : > { %633 = vmatpush.bf16.msra.mxu1 %v1000_v9  ;;  %1007 = vmatpush.bf16.msra.mxu2 %v1000_v9  ;;  %v995_v18 = vld [vmem:[%s1311_s4 + $0x8] sm:$0xff]  ;;  %v994_v19 = vld [vmem:[%s1311_s4] sm:$0xff] }
  0x13   : > { %v1178_v21 = vld [vmem:[%s1309_s2] ss:$0 sm:$0xff] }
  0x14   : > { %v1184_v23 = vld [vmem:[%s1310_s3] ss:$0 sm:$0xff] }
  0x15   : > { %457 = vmatpush.bf16.msra.mxu0 %v991_v2  ;;  %1004 = vmatpush.bf16.msra.mxu3 %v991_v2 }
  0x16   : > { %634 = vmatpush.bf16.msra.mxu1 %v999_v10  ;;  %1008 = vmatpush.bf16.msra.mxu2 %v999_v10 }
  0x19   : > { %458 = vmatpush.bf16.msra.mxu0 %v990_v3  ;;  %1005 = vmatpush.bf16.msra.mxu3 %v990_v3 }
  0x1a   : > { %635 = vmatpush.bf16.msra.mxu1 %v998_v12  ;;  %1009 = vmatpush.bf16.msra.mxu2 %v998_v12 }
  0x1c   : > { %938 = vmatmul.msk.bf16.vlgmr.msra.gmra.mxu0 %vm426_vm0, %v982_v4  ;;  %943 = vmatmul.msk.bf16.vlgmr.msra.gmra.mxu3 %vm426_vm0, %v987_v7 }
  0x1e   : > { %636 = vmatpush.bf16.msra.mxu1 %v997_v16  ;;  %1010 = vmatpush.bf16.msra.mxu2 %v997_v16 }
  0x22   : > { %637 = vmatpush.bf16.msra.mxu1 %v996_v17  ;;  %1011 = vmatpush.bf16.msra.mxu2 %v996_v17 }
  0x26   : > { %638 = vmatpush.bf16.msra.mxu1 %v995_v18  ;;  %1012 = vmatpush.bf16.msra.mxu2 %v995_v18 }
  0x2a   : > { %639 = vmatpush.bf16.msra.mxu1 %v994_v19  ;;  %1013 = vmatpush.bf16.msra.mxu2 %v994_v19 }
  0x2c   : > { %939 = vmatmul.msk.bf16.gmra.mxu0 %vm426_vm0, %v983_v5  ;;  %944 = vmatmul.msk.bf16.gmra.mxu3 %vm426_vm0, %v988_v13 }
  0x3c   : > { %940 = vmatmul.msk.bf16.gmra.mxu0 %vm426_vm0, %v984_v6  ;;  %945 = vmatmul.msk.bf16.gmra.mxu3 %vm426_vm0, %v989_v15 }
  0x4c   : > { %941 = vmatmul.msk.bf16.gmra.mxu0 %vm426_vm0, %v985_v11 }
  0x5c   : > { %942 = vmatmul.msk.bf16.gmra.mxu0 %vm426_vm0, %v986_v14 }
  0x99   : > { %v460_v20 = vpop.f32.mrf.mxu0 }
  0x9a   : > { %v504_v22 = vmul.f32 %v1178_v21, %v460_v20 }
  0x9c   : > { %v524_v25 = vadd.f32 %v1184_v23, %v504_v22 }
  0x9e   : > { %v540_v28 = vmax.f32 %v524_v25, 0.0 }
  0x9f   : > { %v485_v57 = vpop.f32.mrf.mxu3 }
  0xa0   : > { %v514_v6 = vmul.f32 %v1178_v21, %v485_v57 }
  0xa1   : > { %v462_v24 = vpop.f32.mrf.mxu0 }
  0xa2   : > { %v505_v26 = vmul.f32 %v1178_v21, %v462_v24  ;;  %v534_v8 = vadd.f32 %v1184_v23, %v514_v6 }
  0xa4   : > { %v525_v27 = vadd.f32 %v1184_v23, %v505_v26  ;;  %v550_v10 = vmax.f32 %v534_v8, 0.0 }
  0xa6   : > { %v541_v29 = vmax.f32 %v525_v27, 0.0 }
  0xa7   : > { %v487_v62 = vpop.f32.mrf.mxu3 }
  0xa8   : > { %v556_v30 = vpack.c.bf16 %v541_v29, %v540_v28  ;;  %v515_v7 = vmul.f32 %v1178_v21, %v487_v62 }
  0xa9   : > { %v465_v31 = vpop.f32.mrf.mxu0 }
  0xaa   : > { %640 = vmatmul.bf16.vlgmr.msra.gmra.mxu1 %v556_v30  ;;  %v506_v32 = vmul.f32 %v1178_v21, %v465_v31  ;;  %v535_v9 = vadd.f32 %v1184_v23, %v515_v7 }
  0xac   : > { %v526_v34 = vadd.f32 %v1184_v23, %v506_v32  ;;  %v551_v11 = vmax.f32 %v535_v9, 0.0  ;;  %v1220_v32 = vld [vmem:[%s1312_s5] ss:$0 sm:$0xff] }
  0xae   : > { %v542_v37 = vmax.f32 %v526_v34, 0.0  ;;  %v561_v13 = vpack.c.bf16 %v551_v11, %v550_v10 }
  0xaf   : > { %v490_v5 = vpop.f32.mrf.mxu3 }
  0xb0   : > { %v516_v14 = vmul.f32 %v1178_v21, %v490_v5 }
  0xb1   : > { %v467_v33 = vpop.f32.mrf.mxu0 }
  0xb2   : > { %v507_v35 = vmul.f32 %v1178_v21, %v467_v33  ;;  %v536_v17 = vadd.f32 %v1184_v23, %v516_v14 }
  0xb4   : > { %v527_v36 = vadd.f32 %v1184_v23, %v507_v35  ;;  %v552_v19 = vmax.f32 %v536_v17, 0.0 }
  0xb6   : > { %v543_v38 = vmax.f32 %v527_v36, 0.0 }
  0xb7   : > { %v492_v12 = vpop.f32.mrf.mxu3 }
  0xb8   : > { %v557_v39 = vpack.c.bf16 %v543_v38, %v542_v37  ;;  %v517_v15 = vmul.f32 %v1178_v21, %v492_v12 }
  0xb9   : > { %v470_v40 = vpop.f32.mrf.mxu0 }
  0xba   : > { %645 = vmatmul.bf16.gmra.mxu1 %v557_v39  ;;  %v508_v41 = vmul.f32 %v1178_v21, %v470_v40  ;;  %v537_v18 = vadd.f32 %v1184_v23, %v517_v15 }
  0xbc   : > { %v528_v43 = vadd.f32 %v1184_v23, %v508_v41  ;;  %v553_v20 = vmax.f32 %v537_v18, 0.0 }
  0xbe   : > { %v544_v46 = vmax.f32 %v528_v43, 0.0  ;;  %v562_v22 = vpack.c.bf16 %v553_v20, %v552_v19 }
  0xbf   : > { %v495_v16 = vpop.f32.mrf.mxu3 }
  0xc0   : > { %v518_v25 = vmul.f32 %v1178_v21, %v495_v16 }
  0xc1   : > { %v472_v42 = vpop.f32.mrf.mxu0 }
  0xc2   : > { %v509_v44 = vmul.f32 %v1178_v21, %v472_v42  ;;  %v538_v27 = vadd.f32 %v1184_v23, %v518_v25 }
  0xc4   : > { %v529_v45 = vadd.f32 %v1184_v23, %v509_v44  ;;  %v554_v29 = vmax.f32 %v538_v27, 0.0 }
  0xc6   : > { %v545_v47 = vmax.f32 %v529_v45, 0.0 }
  0xc7   : > { %v497_v24 = vpop.f32.mrf.mxu3 }
  0xc8   : > { %v558_v48 = vpack.c.bf16 %v545_v47, %v544_v46  ;;  %v519_v26 = vmul.f32 %v1178_v21, %v497_v24 }
  0xc9   : > { %v475_v49 = vpop.f32.mrf.mxu0 }
  0xca   : > { %650 = vmatmul.bf16.gmra.mxu1 %v558_v48  ;;  %v510_v50 = vmul.f32 %v1178_v21, %v475_v49  ;;  %v539_v28 = vadd.f32 %v1184_v23, %v519_v26 }
  0xcc   : > { %v530_v52 = vadd.f32 %v1184_v23, %v510_v50  ;;  %v555_v30 = vmax.f32 %v539_v28, 0.0 }
  0xce   : > { %v546_v55 = vmax.f32 %v530_v52, 0.0  ;;  %v563_v31 = vpack.c.bf16 %v555_v30, %v554_v29 }
  0xd1   : > { %v477_v51 = vpop.f32.mrf.mxu0 }
  0xd2   : > { %v511_v53 = vmul.f32 %v1178_v21, %v477_v51 }
  0xd4   : > { %v531_v54 = vadd.f32 %v1184_v23, %v511_v53 }
  0xd6   : > { %v547_v56 = vmax.f32 %v531_v54, 0.0 }
  0xd8   : > { %v559_v58 = vpack.c.bf16 %v547_v56, %v546_v55 }
  0xd9   : > { %v480_v59 = vpop.f32.mrf.mxu0 }
  0xda   : > { %655 = vmatmul.bf16.gmra.mxu1 %v559_v58  ;;  %v512_v60 = vmul.f32 %v1178_v21, %v480_v59 }
  0xdc   : > { %v532_v63 = vadd.f32 %v1184_v23, %v512_v60 }
  0xde   : > { %v548_v2 = vmax.f32 %v532_v63, 0.0 }
  0xe1   : > { %v482_v61 = vpop.f32.mrf.mxu0 }
  0xe2   : > { %v513_v0 = vmul.f32 %v1178_v21, %v482_v61 }
  0xe4   : > { %v533_v1 = vadd.f32 %v1184_v23, %v513_v0 }
  0xe6   : > { %v549_v3 = vmax.f32 %v533_v1, 0.0 }
  0xe8   : > { %v560_v4 = vpack.c.bf16 %v549_v3, %v548_v2 }
  0xea   : > { %660 = vmatmul.bf16.vlgmr.msra.gmra.mxu2 %v560_v4 }
  0xfa   : > { %665 = vmatmul.bf16.gmra.mxu2 %v561_v13 }
 0x10a   : > { %670 = vmatmul.bf16.gmra.mxu2 %v562_v22 }
 0x11a   : > { %675 = vmatmul.bf16.gmra.mxu2 %v563_v31 }
 0x127   : > { %v641_v33 = vpop.f32.mrf.mxu1 }
 0x128   : > { %v642_v34 = vadd.f32 %v1220_v32, %v641_v33 }
 0x12a   : > { %v681_v21 = vpack.c.bf16 %v642_v34, %v642_v34  ;;  %v714_v36 = vsel %vm426_vm0, %v642_v34, 0.0 }
 0x12c   : > { %698 = vst.msk [vmem:[%s1228_s23] sm:$0xf] %vm697_vm1, %v681_v21 }
 0x12f   : > { %v643_v23 = vpop.f32.mrf.mxu1 }
 0x130   : > { %v644_v35 = vadd.f32 %v1220_v32, %v643_v23 }
 0x132   : > { %v682_v37 = vpack.c.bf16 %v644_v35, %v644_v35  ;;  %v715_v38 = vsel %vm426_vm0, %v644_v35, 0.0 }
 0x133   : > { %v716_v39 = vadd.f32 %v715_v38, %v714_v36 }
 0x134   : > { %699 = vst.msk [vmem:[%s1228_s23 + $0x4] sm:$0xf] %vm697_vm1, %v682_v37 }
 0x137   : > { %v646_v40 = vpop.f32.mrf.mxu1 }
 0x138   : > { %v647_v41 = vadd.f32 %v1220_v32, %v646_v40 }
 0x13a   : > { %v683_v42 = vpack.c.bf16 %v647_v41, %v647_v41  ;;  %v717_v43 = vsel %vm426_vm0, %v647_v41, 0.0 }
 0x13b   : > { %v718_v44 = vadd.f32 %v717_v43, %v716_v39 }
 0x13c   : > { %700 = vst.msk [vmem:[%s1228_s23 + $0x8] sm:$0xf] %vm697_vm1, %v683_v42 }
 0x13f   : > { %v648_v45 = vpop.f32.mrf.mxu1 }
 0x140   : > { %v649_v46 = vadd.f32 %v1220_v32, %v648_v45 }
 0x142   : > { %v684_v47 = vpack.c.bf16 %v649_v46, %v649_v46  ;;  %v719_v48 = vsel %vm426_vm0, %v649_v46, 0.0 }
 0x143   : > { %v720_v49 = vadd.f32 %v719_v48, %v718_v44 }
 0x144   : > { %701 = vst.msk [vmem:[%s1228_s23 + $0xc] sm:$0xf] %vm697_vm1, %v684_v47 }
 0x147   : > { %v651_v50 = vpop.f32.mrf.mxu1 }
 0x148   : > { %v652_v51 = vadd.f32 %v1220_v32, %v651_v50 }
 0x14a   : > { %v685_v52 = vpack.c.bf16 %v652_v51, %v652_v51  ;;  %v721_v53 = vsel %vm426_vm0, %v652_v51, 0.0 }
 0x14b   : > { %v722_v54 = vadd.f32 %v721_v53, %v720_v49 }
 0x14c   : > { %702 = vst.msk [vmem:[%s1228_s23 + $0x10] sm:$0xf] %vm697_vm1, %v685_v52 }
 0x14f   : > { %v653_v55 = vpop.f32.mrf.mxu1 }
 0x150   : > { %v654_v56 = vadd.f32 %v1220_v32, %v653_v55 }
 0x152   : > { %v686_v57 = vpack.c.bf16 %v654_v56, %v654_v56  ;;  %v723_v58 = vsel %vm426_vm0, %v654_v56, 0.0 }
 0x153   : > { %v724_v59 = vadd.f32 %v723_v58, %v722_v54 }
 0x154   : > { %703 = vst.msk [vmem:[%s1228_s23 + $0x14] sm:$0xf] %vm697_vm1, %v686_v57 }
 0x157   : > { %v656_v60 = vpop.f32.mrf.mxu1 }
 0x158   : > { %v657_v61 = vadd.f32 %v1220_v32, %v656_v60 }
 0x15a   : > { %v687_v62 = vpack.c.bf16 %v657_v61, %v657_v61  ;;  %v725_v17 = vsel %vm426_vm0, %v657_v61, 0.0 }
 0x15b   : > { %v726_v22 = vadd.f32 %v725_v17, %v724_v59 }
 0x15c   : > { %704 = vst.msk [vmem:[%s1228_s23 + $0x18] sm:$0xf] %vm697_vm1, %v687_v62 }
 0x15f   : > { %v658_v63 = vpop.f32.mrf.mxu1 }
 0x160   : > { %v659_v0 = vadd.f32 %v1220_v32, %v658_v63 }
 0x162   : > { %v688_v1 = vpack.c.bf16 %v659_v0, %v659_v0  ;;  %v727_v19 = vsel %vm426_vm0, %v659_v0, 0.0 }
 0x163   : > { %v728_v26 = vadd.f32 %v727_v19, %v726_v22 }
 0x164   : > { %705 = vst.msk [vmem:[%s1228_s23 + $0x1c] sm:$0xf] %vm697_vm1, %v688_v1 }
 0x16d   : > { %v661_v2 = vpop.f32.mrf.mxu2 }
 0x16e   : > { %v662_v3 = vadd.f32 %v1220_v32, %v661_v2 }
 0x170   : > { %v689_v4 = vpack.c.bf16 %v662_v3, %v662_v3  ;;  %v729_v24 = vsel %vm426_vm0, %v662_v3, 0.0 }
 0x171   : > { %v730_v28 = vadd.f32 %v729_v24, %v728_v26 }
 0x172   : > { %706 = vst.msk [vmem:[%s1228_s23 + $0x20] sm:$0xf] %vm697_vm1, %v689_v4 }
 0x175   : > { %v663_v5 = vpop.f32.mrf.mxu2 }
 0x176   : > { %v664_v6 = vadd.f32 %v1220_v32, %v663_v5 }
 0x178   : > { %v690_v7 = vpack.c.bf16 %v664_v6, %v664_v6  ;;  %v731_v27 = vsel %vm426_vm0, %v664_v6, 0.0 }
 0x179   : > { %v732_v30 = vadd.f32 %v731_v27, %v730_v28 }
 0x17a   : > { %707 = vst.msk [vmem:[%s1228_s23 + $0x24] sm:$0xf] %vm697_vm1, %v690_v7 }
 0x17d   : > { %v666_v8 = vpop.f32.mrf.mxu2 }
 0x17e   : > { %v667_v9 = vadd.f32 %v1220_v32, %v666_v8 }
 0x180   : > { %v691_v10 = vpack.c.bf16 %v667_v9, %v667_v9  ;;  %v733_v29 = vsel %vm426_vm0, %v667_v9, 0.0 }
 0x181   : > { %v734_v21 = vadd.f32 %v733_v29, %v732_v30 }
 0x182   : > { %708 = vst.msk [vmem:[%s1228_s23 + $0x28] sm:$0xf] %vm697_vm1, %v691_v10 }
 0x185   : > { %v668_v11 = vpop.f32.mrf.mxu2 }
 0x186   : > { %v669_v12 = vadd.f32 %v1220_v32, %v668_v11 }
 0x188   : > { %v692_v13 = vpack.c.bf16 %v669_v12, %v669_v12  ;;  %v735_v33 = vsel %vm426_vm0, %v669_v12, 0.0 }
 0x189   : > { %v736_v36 = vadd.f32 %v735_v33, %v734_v21 }
 0x18a   : > { %709 = vst.msk [vmem:[%s1228_s23 + $0x2c] sm:$0xf] %vm697_vm1, %v692_v13 }
 0x18d   : > { %v671_v14 = vpop.f32.mrf.mxu2 }
 0x18e   : > { %v672_v15 = vadd.f32 %v1220_v32, %v671_v14 }
 0x190   : > { %v693_v16 = vpack.c.bf16 %v672_v15, %v672_v15  ;;  %v737_v23 = vsel %vm426_vm0, %v672_v15, 0.0 }
 0x191   : > { %v738_v38 = vadd.f32 %v737_v23, %v736_v36 }
 0x192   : > { %710 = vst.msk [vmem:[%s1228_s23 + $0x30] sm:$0xf] %vm697_vm1, %v693_v16 }
 0x195   : > { %v673_v18 = vpop.f32.mrf.mxu2 }
 0x196   : > { %v674_v20 = vadd.f32 %v1220_v32, %v673_v18 }
 0x198   : > { %v694_v25 = vpack.c.bf16 %v674_v20, %v674_v20  ;;  %v739_v37 = vsel %vm426_vm0, %v674_v20, 0.0 }
 0x199   : > { %v740_v40 = vadd.f32 %v739_v37, %v738_v38 }
 0x19a   : > { %711 = vst.msk [vmem:[%s1228_s23 + $0x34] sm:$0xf] %vm697_vm1, %v694_v25 }
 0x19d   : > { %v676_v31 = vpop.f32.mrf.mxu2 }
 0x19e   : > { %v677_v34 = vadd.f32 %v1220_v32, %v676_v31 }
 0x1a0   : > { %v695_v35 = vpack.c.bf16 %v677_v34, %v677_v34  ;;  %v741_v39 = vsel %vm426_vm0, %v677_v34, 0.0 }
 0x1a1   : > { %v742_v43 = vadd.f32 %v741_v39, %v740_v40 }
 0x1a2   : > { %712 = vst.msk [vmem:[%s1228_s23 + $0x38] sm:$0xf] %vm697_vm1, %v695_v35 }
 0x1a5   : > { %v678_v41 = vpop.f32.mrf.mxu2 }
 0x1a6   : > { %v679_v42 = vadd.f32 %v1220_v32, %v678_v41 }
 0x1a8   : > { %v696_v44 = vpack.c.bf16 %v679_v42, %v679_v42  ;;  %v743_v45 = vsel %vm426_vm0, %v679_v42, 0.0 }
 0x1a9   : > { %v744_v46 = vadd.f32 %v743_v45, %v742_v43 }
 0x1aa   : > { %713 = vst.msk [vmem:[%s1228_s23 + $0x3c] sm:$0xf] %vm697_vm1, %v696_v44 }
 0x1ab   : > { %v745_v47 = vrot.slane %v744_v46, 4 }
 0x1ad   : > { %v746_v48 = vadd.f32 %v745_v47, %v744_v46 }
 0x1af   : > { %v747_v49 = vrot.slane %v746_v48, 2 }
 0x1b1   : > { %v748_v50 = vadd.f32 %v747_v49, %v746_v48 }
 0x1b3   : > { %v749_v51 = vrot.slane %v748_v50, 1 }
 0x1b5   : > { %v750_v52 = vadd.f32 %v749_v51, %v748_v50 }
 0x1b7   : > { %751 = vst.msk [vmem:[%s336_s30] sm:$0xff] %vm426_vm0, %v750_v52 }
 0x1b8 PF: > { %s18_s26 = sadd.s32 1, %s1063_s26   ;;  %s1315_s24 = smov %s1059_s25 }
 0x1b9   : > { %p15_p5 = scmp.ge.s32.totalorder %s18_s26, 4   ;;  %s1316_s25 = smov %s1318_s27 }
 0x1bb   :  { %17 = sbr.rel (!%p15_p5) target bundleno = 2 (0x2), region = 86 }

// kernel: hire_mlp_forward.5
= control target key start
LH: loop header
LB: loop body
LE: loop exit
PB: predicated region body
PF: predicated region fallthrough
CT: control target
= control target key end

     0   :  { %13 = vsyncpa [#allocation3], 0  ;;  %s2299_s0 = inlined_call_operand.vmem [shape: bf16[2,256,32], index: 0, kind: input, shape index: {}]   ;;  %s2300_s1 = inlined_call_operand.vmem [shape: bf16[2,256,32], index: 1, kind: input, shape index: {}]   ;;  %s2301_s2 = inlined_call_operand.vmem [shape: bf16[2,256,32], index: 2, kind: input, shape index: {}]   ;;  %s2302_s3 = inlined_call_operand.vmem [shape: f32[2,8,32], index: 3, kind: input, shape index: {}]   ;;  %s2303_s4 = inlined_call_operand.vmem [shape: bf16[32,32], index: 4, kind: input, shape index: {}]   ;;  %s2304_s5 = inlined_call_operand.vmem [shape: f32[1,32], index: 5, kind: input, shape index: {}]   ;;  %s2305_s6 = inlined_call_operand.vmem [shape: bf16[32,32], index: 6, kind: input, shape index: {}]   ;;  %s2306_s7 = inlined_call_operand.vmem [shape: f32[1,32], index: 7, kind: input, shape index: {}]   ;;  %s2307_s8 = inlined_call_operand.hbm [shape: f32[2,256,32], index: 8, kind: output, shape index: {}]  }
   0x1   :  { %15 = vsyncpa [#allocation3 + $0x1], 0  ;;  %s1839_s27 = smov 0   ;;  %s1841_s28 = smov 0  }
   0x2   :  { %s1843_s29 = smov 0   ;;  %s1845_s30 = smov 0  }
   0x3   :  { %s1847_s9 = smov 0   ;;  %s1849_s10 = smov 0  }
   0x4 LB: > { %s1337_s11 = sadd.s32 4294967295, %s1790_s10   ;;  %s1338_s12 = sadd.s32 4294967294, %s1790_s10   ;;  %s1790_s10 = sphi %s1849_s10, %s21_s10   ;;  %s1786_s9 = sphi %s1847_s9, %s2314_s9   ;;  %s1782_s30 = sphi %s1845_s30, %s2313_s30   ;;  %s1778_s29 = sphi %s1843_s29, %s2312_s29   ;;  %s1774_s28 = sphi %s1841_s28, %s2311_s28   ;;  %s1770_s27 = sphi %s1839_s27, %s2310_s27  }
   0x5   : > { %s33_s13 = sadd.s32 1, %s1786_s9  ;;  %s236_s14 = sadd.s32 1, %s1778_s29 }
   0x6   : > { %p35_p0 = scmp.ge.s32.totalorder %s33_s13, 2  ;;  %p246_p1 = scmp.ne.s32.totalorder %s1778_s29, %s1774_s28 }
   0x7   : > { %p247_p2 = scmp.eq.s32.totalorder %s1337_s11, 1  ;;  %p252_p3 = scmp.ne.s32.totalorder %s1774_s28, %s1770_s27 }
   0x8   : > { %s2316_s13 = smov (%p35_p0, %s33_s13), 0  ;;  %p253_p5 = scmp.eq.s32.totalorder %s1338_s12, 1 }
   0x9   : > { %p1879_p4 = por %p247_p2, %p246_p1  ;;  %s231_s16 = ssub.s32 %s1786_s9, %s2316_s13 }
   0xa   : > { %p1341_p6 = scmp.ge.s32.totalorder %s1790_s10, 1  ;;  %p234_p7 = scmp.eq.s32.totalorder %s231_s16, 0 }
   0xb   : > { %p1886_p8 = por %p253_p5, %p252_p3  ;;  %p329_p9 = scmp.lt.s32.totalorder %s1790_s10, 3 }
   0xc   : > { %s1892_s18 = scalar_select %p234_p7, %s1778_s29, %s236_s14  }
   0xd   : > { %p330_p10 = pnand %p1341_p6, %p329_p9 }
   0xe   : > { %p390_p11 = scmp.lt.s32.totalorder (!%p330_p10), %s1782_s30, 1  ;;  %s1490_s12 = sshll.u32 (!%p330_p10), %s1782_s30, 8 }
   0xf   : > { %333 = sbr.rel (%p330_p10) target bundleno = 434 (0x1b2), region = 52  ;;  %s1206_s19 = scalar_lea.hbm (!%p330_p10), %s2307_s8, %s1490_s12 }
  0x10   : > { %s1732_s12 = scalar_lea.hbm (!%p330_p10), %s2307_s8, 512 }
  0x14   : > { %v1487_v0 = vld [vmem:[%s2303_s4 + $0x8] sm:$0xff]  ;;  %v1486_v1 = vld [vmem:[%s2303_s4] sm:$0xff]  ;;  %s1902_s23 = scalar_select %p390_p11, %s1782_s30, 1  ;;  %vm558_vm0 = vcmask 261120  }
  0x15   : > { %613 = vmatpush.bf16.msra.mxu0 %v1487_v0  ;;  %1649 = vmatpush.bf16.msra.mxu2 %v1487_v0  ;;  %v1489_v16 = vld [vmem:[%s2305_s6 + $0x8] sm:$0xff]  ;;  %v1488_v17 = vld [vmem:[%s2305_s6] sm:$0xff] }
  0x16   : > { %s1905_s24 = sshll.u32 %s1902_s23, 7  ;;  %1077 = vmatpush.bf16.msra.mxu1 %v1489_v16  ;;  %1651 = vmatpush.bf16.msra.mxu3 %v1489_v16  ;;  %s1349_s20 = sshll.u32 %s1902_s23, 3  ;;  %v1976_v28 = vld [vmem:[%s2304_s5] ss:$0 sm:$0xff] }
  0x17   : > { %s1911_s11 = scalar_lea.vmem %s2301_s2, %s1905_s24  ;;  %s422_s25 = scalar_lea.vmem %s2302_s3, %s1349_s20 }
  0x18   : > { %v1470_v2 = vld [vmem:[%s1911_s11] sm:$0xff]  ;;  %v1471_v4 = vld [vmem:[%s1911_s11 + $0x8] sm:$0xff]  ;;  %v1472_v6 = vld [vmem:[%s1911_s11 + $0x10] sm:$0xff]  ;;  %s1959_s14 = scalar_lea.vmem %s2299_s0, %s1905_s24  ;;  %s1209_s23 = sshll.u32 %s1206_s19, 4  ;;  %s1210_s23 = int_to_ptr.hbm [resolvable:$true] %s1209_s23 }
  0x19   : > { %614 = vmatpush.bf16.msra.mxu0 %v1486_v1  ;;  %1650 = vmatpush.bf16.msra.mxu2 %v1486_v1  ;;  %v1478_v3 = vld [vmem:[%s1911_s11 + $0x40] sm:$0xff]  ;;  %v1479_v5 = vld [vmem:[%s1911_s11 + $0x48] sm:$0xff]  ;;  %v1480_v7 = vld [vmem:[%s1911_s11 + $0x50] sm:$0xff]  ;;  %s1726_s20 = sshra.s32 %s1210_s23, 4  ;;  %s1727_s20 = int_to_ptr.hbm [resolvable:$true] %s1726_s20 }
  0x1a   : > { %v1473_v8 = vld [vmem:[%s1911_s11 + $0x18] sm:$0xff]  ;;  %v1474_v10 = vld [vmem:[%s1911_s11 + $0x20] sm:$0xff]  ;;  %v1475_v12 = vld [vmem:[%s1911_s11 + $0x28] sm:$0xff]  ;;  %1078 = vmatpush.bf16.msra.mxu1 %v1488_v17  ;;  %1652 = vmatpush.bf16.msra.mxu3 %v1488_v17  ;;  %p1733_p1 = scmp.lt.s32.totalorder %s1727_s20, %s2307_s8 }
  0x1b   : > { %v1481_v9 = vld [vmem:[%s1911_s11 + $0x58] sm:$0xff]  ;;  %v1482_v11 = vld [vmem:[%s1911_s11 + $0x60] sm:$0xff]  ;;  %v1483_v13 = vld [vmem:[%s1911_s11 + $0x68] sm:$0xff] }
  0x1c   : > { %1422 = vmatmul.msk.bf16.vlgmr.msra.gmra.mxu0 %vm558_vm0, %v1470_v2  ;;  %1430 = vmatmul.msk.bf16.vlgmr.msra.gmra.mxu2 %vm558_vm0, %v1478_v3  ;;  %v1476_v14 = vld [vmem:[%s1911_s11 + $0x30] sm:$0xff]  ;;  %v1477_v18 = vld [vmem:[%s1911_s11 + $0x38] sm:$0xff]  ;;  %v1492_v20 = vld [vmem:[%s1959_s14] sm:$0xff]  }
  0x1d   : > { %v1484_v15 = vld [vmem:[%s1911_s11 + $0x70] sm:$0xff]  ;;  %v1485_v19 = vld [vmem:[%s1911_s11 + $0x78] sm:$0xff]  ;;  %s1965_s11 = scalar_lea.vmem %s2300_s1, %s1905_s24  ;;  %v425_v22 = vld [vmem:[%s422_s25] sm:$0xff]  ;;  %v1493_v23 = vunpack.c.l.bf16 %v1492_v20  ;;  %v1494_v29 = vunpack.c.h.bf16 %v1492_v20  ;;  %s386_s24 = sand.u32 1, %s1774_s28  }
  0x1e   : > { %v1556_v21 = vld [vmem:[%s1965_s11] sm:$0xff]   ;;  %v1969_v26 = vperm.slane %v425_v22, 0  ;;  %v1971_v27 = vperm.slane %v425_v22, 1  ;;  %v1983_v36 = vperm.slane %v425_v22, 2  ;;  %v1619_v56 = vld [vmem:[%s1959_s14 + $0x8] sm:$0xff]   ;;  %s1342_s21 = sshll.u32 %s386_s24, 8 }
  0x1f   : > { %v1557_v24 = vunpack.c.l.bf16 %v1556_v21  ;;  %v1558_v30 = vunpack.c.h.bf16 %v1556_v21  ;;  %v1626_v34 = vld [vmem:[%s1959_s14 + $0x40] sm:$0xff]   ;;  %v1634_v57 = vld [vmem:[%s1965_s11 + $0x8] sm:$0xff]   ;;  %v1497_v62 = vunpack.c.l.bf16 %v1619_v56  ;;  %s2163_s26 = scalar_lea.vmem [#allocation2], %s1342_s21  ;;  %s1193_s30 = scalar_lea.sflag [#allocation3], %s386_s24 }
  0x20   : > { %v761_v32 = vmul.f32 %v1493_v23, %v1969_v26  ;;  %v1641_v35 = vld [vmem:[%s1965_s11 + $0x40] sm:$0xff]   ;;  %v762_v37 = vmul.f32 %v1494_v29, %v1969_v26  ;;  %v1525_v40 = vunpack.c.l.bf16 %v1626_v34  ;;  %v1526_v42 = vunpack.c.h.bf16 %v1626_v34  ;;  %s1728_s21 = scalar_lea.hbm %s1727_s20, 256 }
  0x21   : > { %v858_v33 = vmul.f32 %v1557_v24, %v1971_v27  ;;  %v859_v38 = vmul.f32 %v1558_v30, %v1971_v27  ;;  %v1589_v41 = vunpack.c.l.bf16 %v1641_v35  ;;  %v1590_v43 = vunpack.c.h.bf16 %v1641_v35  ;;  %p1729_p12 = scmp.ne.s32.totalorder %s1727_s20, %s1728_s21  ;;  %p1734_p2 = scmp.lt.s32.totalorder %s1732_s12, %s1728_s21 }
  0x22   : > { %v777_v49 = vmul.f32 %v1525_v40, %v1969_v26  ;;  %v778_v51 = vmul.f32 %v1526_v42, %v1969_v26  ;;  %v1561_v1 = vunpack.c.l.bf16 %v1634_v57 }
  0x23   : > { %v890_v44 = vadd.f32 %v858_v33, %v761_v32  ;;  %v891_v48 = vadd.f32 %v859_v38, %v762_v37  ;;  %v874_v50 = vmul.f32 %v1589_v41, %v1971_v27  ;;  %v875_v52 = vmul.f32 %v1590_v43, %v1971_v27  ;;  %v1620_v38 = vld [vmem:[%s1959_s14 + $0x10] sm:$0xff]   ;;  %p1730_p13 = pnand %p1729_p12, %p1879_p4  ;;  %p1735_p3 = por %p1734_p2, %p1733_p1 }
  0x25   : > { %v906_v59 = vadd.f32 %v874_v50, %v777_v49  ;;  %v907_v61 = vadd.f32 %v875_v52, %v778_v51  ;;  %v1502_v51 = vunpack.c.h.bf16 %v1620_v38  ;;  %p1731_p0 = pneg %p1730_p13 }
  0x27   : > { %p1736_p5 = pnand %p1735_p3, %p1731_p0 }
  0x2c   : > { %1423 = vmatmul.msk.bf16.gmra.mxu0 %vm558_vm0, %v1471_v4  ;;  %1431 = vmatmul.msk.bf16.gmra.mxu2 %vm558_vm0, %v1479_v5  ;;  %v1498_v5 = vunpack.c.h.bf16 %v1619_v56 }
  0x3c   : > { %1424 = vmatmul.msk.bf16.gmra.mxu0 %vm558_vm0, %v1472_v6  ;;  %1432 = vmatmul.msk.bf16.gmra.mxu2 %vm558_vm0, %v1480_v7  ;;  %v1562_v6 = vunpack.c.h.bf16 %v1634_v57  ;;  %v763_v7 = vmul.f32 %v1497_v62, %v1969_v26 }
  0x3e   : > { %v861_v16 = vmul.f32 %v1562_v6, %v1971_v27 }
  0x4c   : > { %1425 = vmatmul.msk.bf16.gmra.mxu0 %vm558_vm0, %v1473_v8  ;;  %1433 = vmatmul.msk.bf16.gmra.mxu2 %vm558_vm0, %v1481_v9 }
  0x5c   : > { %1426 = vmatmul.msk.bf16.gmra.mxu0 %vm558_vm0, %v1474_v10  ;;  %1434 = vmatmul.msk.bf16.gmra.mxu2 %vm558_vm0, %v1482_v11  ;;  %v860_v11 = vmul.f32 %v1561_v1, %v1971_v27 }
  0x5e   : > { %v892_v22 = vadd.f32 %v860_v11, %v763_v7 }
  0x6c   : > { %1427 = vmatmul.msk.bf16.gmra.mxu0 %vm558_vm0, %v1475_v12  ;;  %1435 = vmatmul.msk.bf16.gmra.mxu2 %vm558_vm0, %v1483_v13  ;;  %v1627_v12 = vld [vmem:[%s1959_s14 + $0x48] sm:$0xff]  }
  0x6d   : > { %v1642_v13 = vld [vmem:[%s1965_s11 + $0x48] sm:$0xff]   ;;  %v1530_v20 = vunpack.c.h.bf16 %v1627_v12 }
  0x6e   : > { %v1594_v21 = vunpack.c.h.bf16 %v1642_v13 }
  0x6f   : > { %v780_v32 = vmul.f32 %v1530_v20, %v1969_v26 }
  0x70   : > { %v877_v33 = vmul.f32 %v1594_v21, %v1971_v27 }
  0x72   : > { %v909_v43 = vadd.f32 %v877_v33, %v780_v32 }
  0x7c   : > { %1428 = vmatmul.msk.bf16.gmra.mxu0 %vm558_vm0, %v1476_v14  ;;  %1436 = vmatmul.msk.bf16.gmra.mxu2 %vm558_vm0, %v1484_v15  ;;  %v764_v15 = vmul.f32 %v1498_v5, %v1969_v26 }
  0x7e   : > { %v893_v29 = vadd.f32 %v861_v16, %v764_v15  ;;  %v1621_v16 = vld [vmem:[%s1959_s14 + $0x18] sm:$0xff]  }
  0x7f   : > { %v1506_v32 = vunpack.c.h.bf16 %v1621_v16 }
  0x8c   : > { %1429 = vmatmul.msk.bf16.gmra.mxu0 %vm558_vm0, %v1477_v18  ;;  %1437 = vmatmul.msk.bf16.gmra.mxu2 %vm558_vm0, %v1485_v19  ;;  %v1529_v18 = vunpack.c.l.bf16 %v1627_v12  ;;  %v1593_v19 = vunpack.c.l.bf16 %v1642_v13 }
  0x8e   : > { %v779_v30 = vmul.f32 %v1529_v18, %v1969_v26 }
  0x99   : > { %v616_v25 = vpop.f32.mrf.mxu0 }
  0x9a   : > { %v617_v31 = vadd.f32 %v1976_v28, %v616_v25 }
  0x9c   : > { %v923_v45 = vmul.f32 %v1983_v36, %v617_v31  ;;  %v876_v31 = vmul.f32 %v1593_v19, %v1971_v27 }
  0x9e   : > { %v955_v53 = vadd.f32 %v923_v45, %v890_v44  ;;  %v908_v41 = vadd.f32 %v876_v31, %v779_v30  ;;  %v1501_v44 = vunpack.c.l.bf16 %v1620_v38 }
  0x9f   : > { %v656_v39 = vpop.f32.mrf.mxu2 }
  0xa0   : > { %v657_v54 = vadd.f32 %v1976_v28, %v656_v39  ;;  %v1635_v39 = vld [vmem:[%s1965_s11 + $0x10] sm:$0xff]  }
  0xa1   : > { %v618_v46 = vpop.f32.mrf.mxu0  ;;  %v1566_v52 = vunpack.c.h.bf16 %v1635_v39 }
  0xa2   : > { %v619_v47 = vadd.f32 %v1976_v28, %v618_v46  ;;  %v939_v63 = vmul.f32 %v1983_v36, %v657_v54 }
  0xa3   : > { %v863_v62 = vmul.f32 %v1566_v52, %v1971_v27 }
  0xa4   : > { %v924_v55 = vmul.f32 %v1983_v36, %v619_v47  ;;  %v971_v8 = vadd.f32 %v939_v63, %v906_v59  ;;  %v1565_v47 = vunpack.c.l.bf16 %v1635_v39  ;;  %v1643_v59 = vld [vmem:[%s1965_s11 + $0x50] sm:$0xff]  }
  0xa5   : > { %v1597_v1 = vunpack.c.l.bf16 %v1643_v59 }
  0xa6   : > { %v956_v58 = vadd.f32 %v924_v55, %v891_v48  ;;  %v862_v57 = vmul.f32 %v1565_v47, %v1971_v27 }
  0xa7   : > { %v658_v60 = vpop.f32.mrf.mxu2 }
  0xa8   : > { %v659_v0 = vadd.f32 %v1976_v28, %v658_v60  ;;  %v987_v2 = vpack.c.bf16 %v956_v58, %v955_v53  ;;  %v765_v53 = vmul.f32 %v1501_v44, %v1969_v26  ;;  %v1628_v58 = vld [vmem:[%s1959_s14 + $0x50] sm:$0xff]  }
  0xa9   : > { %v621_v3 = vpop.f32.mrf.mxu0 }
  0xaa   : > { %v940_v4 = vmul.f32 %v1983_v36, %v659_v0  ;;  %1446 = vmatmul.msk.bf16.vlgmr.msra.gmra.mxu1 %vm558_vm0, %v987_v2  ;;  %v622_v10 = vadd.f32 %v1976_v28, %v621_v3  ;;  %v1533_v0 = vunpack.c.l.bf16 %v1628_v58  ;;  %v1534_v2 = vunpack.c.h.bf16 %v1628_v58 }
  0xab   : > { %v1598_v3 = vunpack.c.h.bf16 %v1643_v59 }
  0xac   : > { %v972_v9 = vadd.f32 %v940_v4, %v907_v61  ;;  %v925_v23 = vmul.f32 %v1983_v36, %v622_v10  ;;  %v766_v61 = vmul.f32 %v1502_v51, %v1969_v26  ;;  %v894_v4 = vadd.f32 %v862_v57, %v765_v53 }
  0xad   : > { %v878_v10 = vmul.f32 %v1597_v1, %v1971_v27  ;;  %v782_v11 = vmul.f32 %v1534_v2, %v1969_v26  ;;  %v879_v12 = vmul.f32 %v1598_v3, %v1971_v27 }
  0xae   : > { %v995_v14 = vpack.c.bf16 %v972_v9, %v971_v8  ;;  %v957_v34 = vadd.f32 %v925_v23, %v892_v22  ;;  %v895_v8 = vadd.f32 %v863_v62, %v766_v61  ;;  %v781_v9 = vmul.f32 %v1533_v0, %v1969_v26  ;;  %v1622_v62 = vld [vmem:[%s1959_s14 + $0x20] sm:$0xff]  }
  0xaf   : > { %v661_v17 = vpop.f32.mrf.mxu2  ;;  %v911_v21 = vadd.f32 %v879_v12, %v782_v11  ;;  %v1505_v22 = vunpack.c.l.bf16 %v1621_v16  ;;  %v1510_v11 = vunpack.c.h.bf16 %v1622_v62 }
  0xb0   : > { %1454 = vmatmul.msk.bf16.vlgmr.msra.gmra.mxu3 %vm558_vm0, %v995_v14  ;;  %v662_v35 = vadd.f32 %v1976_v28, %v661_v17  ;;  %v1636_v17 = vld [vmem:[%s1965_s11 + $0x18] sm:$0xff]   ;;  %v910_v19 = vadd.f32 %v878_v10, %v781_v9 }
  0xb1   : > { %v623_v24 = vpop.f32.mrf.mxu0  ;;  %v1570_v33 = vunpack.c.h.bf16 %v1636_v17 }
  0xb2   : > { %v624_v25 = vadd.f32 %v1976_v28, %v623_v24  ;;  %v941_v45 = vmul.f32 %v1983_v36, %v662_v35 }
  0xb3   : > { %v865_v44 = vmul.f32 %v1570_v33, %v1971_v27 }
  0xb4   : > { %v926_v37 = vmul.f32 %v1983_v36, %v624_v25  ;;  %v973_v54 = vadd.f32 %v941_v45, %v908_v41  ;;  %v1569_v25 = vunpack.c.l.bf16 %v1636_v17  ;;  %v1644_v41 = vld [vmem:[%s1965_s11 + $0x58] sm:$0xff]  }
  0xb5   : > { %v1601_v47 = vunpack.c.l.bf16 %v1644_v41 }
  0xb6   : > { %v958_v40 = vadd.f32 %v926_v37, %v893_v29  ;;  %v864_v39 = vmul.f32 %v1569_v25, %v1971_v27 }
  0xb7   : > { %v663_v42 = vpop.f32.mrf.mxu2 }
  0xb8   : > { %v664_v46 = vadd.f32 %v1976_v28, %v663_v42  ;;  %v988_v48 = vpack.c.bf16 %v958_v40, %v957_v34  ;;  %v767_v34 = vmul.f32 %v1505_v22, %v1969_v26  ;;  %v1629_v40 = vld [vmem:[%s1959_s14 + $0x58] sm:$0xff]  }
  0xb9   : > { %v626_v49 = vpop.f32.mrf.mxu0 }
  0xba   : > { %v942_v50 = vmul.f32 %v1983_v36, %v664_v46  ;;  %1447 = vmatmul.msk.bf16.gmra.mxu1 %vm558_vm0, %v988_v48  ;;  %v627_v56 = vadd.f32 %v1976_v28, %v626_v49  ;;  %v1537_v46 = vunpack.c.l.bf16 %v1629_v40  ;;  %v1538_v48 = vunpack.c.h.bf16 %v1629_v40 }
  0xbb   : > { %v1602_v49 = vunpack.c.h.bf16 %v1644_v41 }
  0xbc   : > { %v974_v55 = vadd.f32 %v942_v50, %v909_v43  ;;  %v927_v5 = vmul.f32 %v1983_v36, %v627_v56  ;;  %v768_v43 = vmul.f32 %v1506_v32, %v1969_v26  ;;  %v896_v50 = vadd.f32 %v864_v39, %v767_v34 }
  0xbd   : > { %v880_v56 = vmul.f32 %v1601_v47, %v1971_v27  ;;  %v784_v57 = vmul.f32 %v1538_v48, %v1969_v26  ;;  %v881_v58 = vmul.f32 %v1602_v49, %v1971_v27 }
  0xbe   : > { %v996_v60 = vpack.c.bf16 %v974_v55, %v973_v54  ;;  %v959_v13 = vadd.f32 %v927_v5, %v894_v4  ;;  %v897_v54 = vadd.f32 %v865_v44, %v768_v43  ;;  %v783_v55 = vmul.f32 %v1537_v46, %v1969_v26  ;;  %v1623_v44 = vld [vmem:[%s1959_s14 + $0x28] sm:$0xff]  }
  0xbf   : > { %v666_v63 = vpop.f32.mrf.mxu2  ;;  %v913_v3 = vadd.f32 %v881_v58, %v784_v57  ;;  %v1509_v4 = vunpack.c.l.bf16 %v1622_v62  ;;  %v1514_v57 = vunpack.c.h.bf16 %v1623_v44 }
  0xc0   : > { %1455 = vmatmul.msk.bf16.gmra.mxu3 %vm558_vm0, %v996_v60  ;;  %v667_v14 = vadd.f32 %v1976_v28, %v666_v63  ;;  %v1637_v63 = vld [vmem:[%s1965_s11 + $0x20] sm:$0xff]   ;;  %v912_v1 = vadd.f32 %v880_v56, %v783_v55 }
  0xc1   : > { %v628_v6 = vpop.f32.mrf.mxu0  ;;  %v1574_v12 = vunpack.c.h.bf16 %v1637_v63 }
  0xc2   : > { %v629_v7 = vadd.f32 %v1976_v28, %v628_v6  ;;  %v943_v23 = vmul.f32 %v1983_v36, %v667_v14 }
  0xc3   : > { %v867_v22 = vmul.f32 %v1574_v12, %v1971_v27 }
  0xc4   : > { %v928_v15 = vmul.f32 %v1983_v36, %v629_v7  ;;  %v975_v35 = vadd.f32 %v943_v23, %v910_v19  ;;  %v1573_v7 = vunpack.c.l.bf16 %v1637_v63  ;;  %v1645_v19 = vld [vmem:[%s1965_s11 + $0x60] sm:$0xff]  }
  0xc5   : > { %v1605_v25 = vunpack.c.l.bf16 %v1645_v19 }
  0xc6   : > { %v960_v18 = vadd.f32 %v928_v15, %v895_v8  ;;  %v866_v17 = vmul.f32 %v1573_v7, %v1971_v27 }
  0xc7   : > { %v668_v20 = vpop.f32.mrf.mxu2 }
  0xc8   : > { %v669_v24 = vadd.f32 %v1976_v28, %v668_v20  ;;  %v989_v29 = vpack.c.bf16 %v960_v18, %v959_v13  ;;  %v769_v13 = vmul.f32 %v1509_v4, %v1969_v26  ;;  %v1630_v18 = vld [vmem:[%s1959_s14 + $0x60] sm:$0xff]  }
  0xc9   : > { %v631_v30 = vpop.f32.mrf.mxu0 }
  0xca   : > { %v944_v31 = vmul.f32 %v1983_v36, %v669_v24  ;;  %1448 = vmatmul.msk.bf16.gmra.mxu1 %vm558_vm0, %v989_v29  ;;  %v632_v38 = vadd.f32 %v1976_v28, %v631_v30  ;;  %v1541_v24 = vunpack.c.l.bf16 %v1630_v18  ;;  %v1542_v29 = vunpack.c.h.bf16 %v1630_v18 }
  0xcb   : > { %v1606_v30 = vunpack.c.h.bf16 %v1645_v19 }
  0xcc   : > { %v976_v37 = vadd.f32 %v944_v31, %v911_v21  ;;  %v929_v51 = vmul.f32 %v1983_v36, %v632_v38  ;;  %v770_v21 = vmul.f32 %v1510_v11, %v1969_v26  ;;  %v898_v31 = vadd.f32 %v866_v17, %v769_v13 }
  0xcd   : > { %v882_v38 = vmul.f32 %v1605_v25, %v1971_v27  ;;  %v786_v39 = vmul.f32 %v1542_v29, %v1969_v26  ;;  %v883_v40 = vmul.f32 %v1606_v30, %v1971_v27 }
  0xce   : > { %v997_v42 = vpack.c.bf16 %v976_v37, %v975_v35  ;;  %v961_v59 = vadd.f32 %v929_v51, %v896_v50  ;;  %v899_v35 = vadd.f32 %v867_v22, %v770_v21  ;;  %v785_v37 = vmul.f32 %v1541_v24, %v1969_v26  ;;  %v1624_v22 = vld [vmem:[%s1959_s14 + $0x30] sm:$0xff]  }
  0xcf   : > { %v671_v45 = vpop.f32.mrf.mxu2  ;;  %v915_v49 = vadd.f32 %v883_v40, %v786_v39  ;;  %v1513_v50 = vunpack.c.l.bf16 %v1623_v44  ;;  %v1518_v39 = vunpack.c.h.bf16 %v1624_v22 }
  0xd0   : > { %1456 = vmatmul.msk.bf16.gmra.mxu3 %vm558_vm0, %v997_v42  ;;  %v672_v60 = vadd.f32 %v1976_v28, %v671_v45  ;;  %v1638_v45 = vld [vmem:[%s1965_s11 + $0x28] sm:$0xff]   ;;  %v914_v47 = vadd.f32 %v882_v38, %v785_v37 }
  0xd1   : > { %v633_v52 = vpop.f32.mrf.mxu0  ;;  %v1578_v58 = vunpack.c.h.bf16 %v1638_v45 }
  0xd2   : > { %v634_v53 = vadd.f32 %v1976_v28, %v633_v52  ;;  %v945_v5 = vmul.f32 %v1983_v36, %v672_v60 }
  0xd3   : > { %v869_v4 = vmul.f32 %v1578_v58, %v1971_v27 }
  0xd4   : > { %v930_v61 = vmul.f32 %v1983_v36, %v634_v53  ;;  %v977_v14 = vadd.f32 %v945_v5, %v912_v1  ;;  %v1577_v53 = vunpack.c.l.bf16 %v1638_v45  ;;  %v1646_v1 = vld [vmem:[%s1965_s11 + $0x68] sm:$0xff]  }
  0xd5   : > { %v1609_v7 = vunpack.c.l.bf16 %v1646_v1 }
  0xd6   : > { %v962_v0 = vadd.f32 %v930_v61, %v897_v54  ;;  %v868_v63 = vmul.f32 %v1577_v53, %v1971_v27 }
  0xd7   : > { %v673_v2 = vpop.f32.mrf.mxu2 }
  0xd8   : > { %v674_v6 = vadd.f32 %v1976_v28, %v673_v2  ;;  %v990_v8 = vpack.c.bf16 %v962_v0, %v961_v59  ;;  %v771_v59 = vmul.f32 %v1513_v50, %v1969_v26  ;;  %v1631_v0 = vld [vmem:[%s1959_s14 + $0x68] sm:$0xff]  }
  0xd9   : > { %v636_v9 = vpop.f32.mrf.mxu0 }
  0xda   : > { %v946_v10 = vmul.f32 %v1983_v36, %v674_v6  ;;  %1449 = vmatmul.msk.bf16.gmra.mxu1 %vm558_vm0, %v990_v8  ;;  %v637_v16 = vadd.f32 %v1976_v28, %v636_v9  ;;  %v1545_v6 = vunpack.c.l.bf16 %v1631_v0  ;;  %v1546_v8 = vunpack.c.h.bf16 %v1631_v0 }
  0xdb   : > { %v1610_v9 = vunpack.c.h.bf16 %v1646_v1 }
  0xdc   : > { %v978_v15 = vadd.f32 %v946_v10, %v913_v3  ;;  %v931_v32 = vmul.f32 %v1983_v36, %v637_v16  ;;  %v772_v3 = vmul.f32 %v1514_v57, %v1969_v26  ;;  %v900_v10 = vadd.f32 %v868_v63, %v771_v59 }
  0xdd   : > { %v884_v16 = vmul.f32 %v1609_v7, %v1971_v27  ;;  %v788_v17 = vmul.f32 %v1546_v8, %v1969_v26  ;;  %v885_v18 = vmul.f32 %v1610_v9, %v1971_v27 }
  0xde   : > { %v998_v20 = vpack.c.bf16 %v978_v15, %v977_v14  ;;  %v963_v41 = vadd.f32 %v931_v32, %v898_v31  ;;  %v901_v14 = vadd.f32 %v869_v4, %v772_v3  ;;  %v787_v15 = vmul.f32 %v1545_v6, %v1969_v26  ;;  %v1625_v4 = vld [vmem:[%s1959_s14 + $0x38] sm:$0xff]  }
  0xdf   : > { %v676_v23 = vpop.f32.mrf.mxu2  ;;  %v917_v30 = vadd.f32 %v885_v18, %v788_v17  ;;  %v1517_v31 = vunpack.c.l.bf16 %v1624_v22  ;;  %v1522_v17 = vunpack.c.h.bf16 %v1625_v4 }
  0xe0   : > { %1457 = vmatmul.msk.bf16.gmra.mxu3 %vm558_vm0, %v998_v20  ;;  %v677_v42 = vadd.f32 %v1976_v28, %v676_v23  ;;  %v1639_v23 = vld [vmem:[%s1965_s11 + $0x30] sm:$0xff]   ;;  %v916_v25 = vadd.f32 %v884_v16, %v787_v15 }
  0xe1   : > { %v638_v33 = vpop.f32.mrf.mxu0  ;;  %v1582_v40 = vunpack.c.h.bf16 %v1639_v23 }
  0xe2   : > { %v639_v34 = vadd.f32 %v1976_v28, %v638_v33  ;;  %v947_v51 = vmul.f32 %v1983_v36, %v677_v42 }
  0xe3   : > { %v871_v50 = vmul.f32 %v1582_v40, %v1971_v27 }
  0xe4   : > { %v932_v43 = vmul.f32 %v1983_v36, %v639_v34  ;;  %v979_v60 = vadd.f32 %v947_v51, %v914_v47  ;;  %v1581_v34 = vunpack.c.l.bf16 %v1639_v23  ;;  %v1647_v47 = vld [vmem:[%s1965_s11 + $0x70] sm:$0xff]  }
  0xe5   : > { %v1613_v53 = vunpack.c.l.bf16 %v1647_v47 }
  0xe6   : > { %v964_v46 = vadd.f32 %v932_v43, %v899_v35  ;;  %v870_v45 = vmul.f32 %v1581_v34, %v1971_v27 }
  0xe7   : > { %v678_v48 = vpop.f32.mrf.mxu2 }
  0xe8   : > { %v679_v52 = vadd.f32 %v1976_v28, %v678_v48  ;;  %v991_v54 = vpack.c.bf16 %v964_v46, %v963_v41  ;;  %v773_v41 = vmul.f32 %v1517_v31, %v1969_v26  ;;  %v1632_v46 = vld [vmem:[%s1959_s14 + $0x70] sm:$0xff]  }
  0xe9   : > { %v641_v55 = vpop.f32.mrf.mxu0 }
  0xea   : > { %v948_v56 = vmul.f32 %v1983_v36, %v679_v52  ;;  %1450 = vmatmul.msk.bf16.gmra.mxu1 %vm558_vm0, %v991_v54  ;;  %v642_v62 = vadd.f32 %v1976_v28, %v641_v55  ;;  %v1549_v52 = vunpack.c.l.bf16 %v1632_v46  ;;  %v1550_v54 = vunpack.c.h.bf16 %v1632_v46 }
  0xeb   : > { %v1614_v55 = vunpack.c.h.bf16 %v1647_v47 }
  0xec   : > { %v980_v61 = vadd.f32 %v948_v56, %v915_v49  ;;  %v933_v11 = vmul.f32 %v1983_v36, %v642_v62  ;;  %v774_v49 = vmul.f32 %v1518_v39, %v1969_v26  ;;  %v902_v56 = vadd.f32 %v870_v45, %v773_v41 }
  0xed   : > { %v886_v62 = vmul.f32 %v1613_v53, %v1971_v27  ;;  %v790_v63 = vmul.f32 %v1550_v54, %v1969_v26  ;;  %v887_v0 = vmul.f32 %v1614_v55, %v1971_v27 }
  0xee   : > { %v999_v2 = vpack.c.bf16 %v980_v61, %v979_v60  ;;  %v965_v19 = vadd.f32 %v933_v11, %v900_v10  ;;  %v903_v60 = vadd.f32 %v871_v50, %v774_v49  ;;  %v789_v61 = vmul.f32 %v1549_v52, %v1969_v26 }
  0xef   : > { %v681_v5 = vpop.f32.mrf.mxu2  ;;  %v919_v9 = vadd.f32 %v887_v0, %v790_v63  ;;  %v1521_v10 = vunpack.c.l.bf16 %v1625_v4 }
  0xf0   : > { %1458 = vmatmul.msk.bf16.gmra.mxu3 %vm558_vm0, %v999_v2  ;;  %v682_v20 = vadd.f32 %v1976_v28, %v681_v5  ;;  %v1640_v5 = vld [vmem:[%s1965_s11 + $0x38] sm:$0xff]   ;;  %v918_v7 = vadd.f32 %v886_v62, %v789_v61 }
  0xf1   : > { %v643_v12 = vpop.f32.mrf.mxu0  ;;  %v1586_v18 = vunpack.c.h.bf16 %v1640_v5 }
  0xf2   : > { %v644_v13 = vadd.f32 %v1976_v28, %v643_v12  ;;  %v949_v32 = vmul.f32 %v1983_v36, %v682_v20 }
  0xf3   : > { %v873_v31 = vmul.f32 %v1586_v18, %v1971_v27 }
  0xf4   : > { %v934_v21 = vmul.f32 %v1983_v36, %v644_v13  ;;  %v981_v42 = vadd.f32 %v949_v32, %v916_v25  ;;  %v1585_v13 = vunpack.c.l.bf16 %v1640_v5  ;;  %v1648_v25 = vld [vmem:[%s1965_s11 + $0x78] sm:$0xff]   ;;  %s1207_s11 = sshll.u32 %s2163_s26, 4  ;;  %s1208_s11 = int_to_ptr.vmem [resolvable:$true] %s1207_s11 }
  0xf5   : > { %v1617_v34 = vunpack.c.l.bf16 %v1648_v25  ;;  %v1618_v39 = vunpack.c.h.bf16 %v1648_v25 }
  0xf6   : > { %v966_v24 = vadd.f32 %v934_v21, %v901_v14  ;;  %v872_v23 = vmul.f32 %v1585_v13, %v1971_v27 }
  0xf7   : > { %v683_v29 = vpop.f32.mrf.mxu2  ;;  %v889_v49 = vmul.f32 %v1618_v39, %v1971_v27 }
  0xf8   : > { %v684_v33 = vadd.f32 %v1976_v28, %v683_v29  ;;  %v992_v35 = vpack.c.bf16 %v966_v24, %v965_v19  ;;  %v775_v19 = vmul.f32 %v1521_v10, %v1969_v26  ;;  %v1633_v24 = vld [vmem:[%s1959_s14 + $0x78] sm:$0xff]  }
  0xf9   : > { %v646_v37 = vpop.f32.mrf.mxu0 }
  0xfa   : > { %v950_v38 = vmul.f32 %v1983_v36, %v684_v33  ;;  %1451 = vmatmul.msk.bf16.gmra.mxu1 %vm558_vm0, %v992_v35  ;;  %v647_v44 = vadd.f32 %v1976_v28, %v646_v37  ;;  %v1553_v33 = vunpack.c.l.bf16 %v1633_v24  ;;  %v1554_v35 = vunpack.c.h.bf16 %v1633_v24 }
  0xfb   : > { %v904_v37 = vadd.f32 %v872_v23, %v775_v19 }
  0xfc   : > { %v982_v43 = vadd.f32 %v950_v38, %v917_v30  ;;  %v935_v57 = vmul.f32 %v1983_v36, %v647_v44  ;;  %v776_v30 = vmul.f32 %v1522_v17, %v1969_v26  ;;  %v888_v44 = vmul.f32 %v1617_v34, %v1971_v27  ;;  %v2160_v27 = vld [vmem:[%s2306_s7] ss:$0 sm:$0xff] }
  0xfd   : > { %v792_v45 = vmul.f32 %v1554_v35, %v1969_v26 }
  0xfe   : > { %v1000_v48 = vpack.c.bf16 %v982_v43, %v981_v42  ;;  %v967_v1 = vadd.f32 %v935_v57, %v902_v56  ;;  %v905_v42 = vadd.f32 %v873_v31, %v776_v30  ;;  %v791_v43 = vmul.f32 %v1553_v33, %v1969_v26 }
  0xff   : > { %v686_v51 = vpop.f32.mrf.mxu2  ;;  %v921_v55 = vadd.f32 %v889_v49, %v792_v45 }
 0x100   : > { %1459 = vmatmul.msk.bf16.gmra.mxu3 %vm558_vm0, %v1000_v48  ;;  %v687_v2 = vadd.f32 %v1976_v28, %v686_v51  ;;  %v920_v51 = vadd.f32 %v888_v44, %v791_v43 }
 0x101   : > { %v648_v58 = vpop.f32.mrf.mxu0 }
 0x102   : > { %v649_v59 = vadd.f32 %v1976_v28, %v648_v58  ;;  %v951_v11 = vmul.f32 %v1983_v36, %v687_v2 }
 0x104   : > { %v936_v3 = vmul.f32 %v1983_v36, %v649_v59  ;;  %v983_v20 = vadd.f32 %v951_v11, %v918_v7 }
 0x106   : > { %v968_v6 = vadd.f32 %v936_v3, %v903_v60 }
 0x107   : > { %v688_v8 = vpop.f32.mrf.mxu2 }
 0x108   : > { %v689_v12 = vadd.f32 %v1976_v28, %v688_v8  ;;  %v993_v14 = vpack.c.bf16 %v968_v6, %v967_v1 }
 0x109   : > { %v651_v15 = vpop.f32.mrf.mxu0 }
 0x10a   : > { %v952_v16 = vmul.f32 %v1983_v36, %v689_v12  ;;  %1452 = vmatmul.msk.bf16.gmra.mxu1 %vm558_vm0, %v993_v14  ;;  %v652_v22 = vadd.f32 %v1976_v28, %v651_v15 }
 0x10c   : > { %v984_v21 = vadd.f32 %v952_v16, %v919_v9  ;;  %v937_v38 = vmul.f32 %v1983_v36, %v652_v22 }
 0x10e   : > { %v1001_v29 = vpack.c.bf16 %v984_v21, %v983_v20  ;;  %v969_v46 = vadd.f32 %v937_v38, %v904_v37 }
 0x10f   : > { %v691_v32 = vpop.f32.mrf.mxu2 }
 0x110   : > { %1460 = vmatmul.msk.bf16.gmra.mxu3 %vm558_vm0, %v1001_v29  ;;  %v692_v47 = vadd.f32 %v1976_v28, %v691_v32 }
 0x111   : > { %v653_v40 = vpop.f32.mrf.mxu0 }
 0x112   : > { %v654_v41 = vadd.f32 %v1976_v28, %v653_v40  ;;  %v953_v53 = vmul.f32 %v1983_v36, %v692_v47 }
 0x114   : > { %v938_v48 = vmul.f32 %v1983_v36, %v654_v41  ;;  %v985_v57 = vadd.f32 %v953_v53, %v920_v51 }
 0x116   : > { %v970_v50 = vadd.f32 %v938_v48, %v905_v42 }
 0x117   : > { %v693_v52 = vpop.f32.mrf.mxu2 }
 0x118   : > { %v694_v54 = vadd.f32 %v1976_v28, %v693_v52  ;;  %v994_v56 = vpack.c.bf16 %v970_v50, %v969_v46 }
 0x11a   : > { %v954_v26 = vmul.f32 %v1983_v36, %v694_v54  ;;  %1453 = vmatmul.msk.bf16.gmra.mxu1 %vm558_vm0, %v994_v56 }
 0x11c   : > { %v986_v58 = vadd.f32 %v954_v26, %v921_v55 }
 0x11e   : > { %v1002_v59 = vpack.c.bf16 %v986_v58, %v985_v57 }
 0x120   : > { %1461 = vmatmul.msk.bf16.gmra.mxu3 %vm558_vm0, %v1002_v59 }
 0x127   : > { %v1080_v28 = vpop.f32.mrf.mxu1 }
 0x128   : > { %v1081_v60 = vadd.f32 %v2160_v27, %v1080_v28 }
 0x12a   : > { %1160 = vst.msk [vmem:[%s2163_s26] sm:$0xff] %vm558_vm0, %v1081_v60 }
 0x12f   : > { %v1082_v36 = vpop.f32.mrf.mxu1 }
 0x130   : > { %v1083_v61 = vadd.f32 %v2160_v27, %v1082_v36 }
 0x132   : > { %1161 = vst.msk [vmem:[%s2163_s26 + $0x8] sm:$0xff] %vm558_vm0, %v1083_v61 }
 0x133   : > { %v1120_v62 = vpop.f32.mrf.mxu3 }
 0x134   : > { %v1121_v63 = vadd.f32 %v2160_v27, %v1120_v62 }
 0x136   : > { %1176 = vst.msk [vmem:[%s2163_s26 + $0x80] sm:$0xff] %vm558_vm0, %v1121_v63 }
 0x137   : > { %v1085_v0 = vpop.f32.mrf.mxu1 }
 0x138   : > { %v1086_v1 = vadd.f32 %v2160_v27, %v1085_v0 }
 0x13a   : > { %1162 = vst.msk [vmem:[%s2163_s26 + $0x10] sm:$0xff] %vm558_vm0, %v1086_v1 }
 0x13b   : > { %v1122_v2 = vpop.f32.mrf.mxu3 }
 0x13c   : > { %v1123_v3 = vadd.f32 %v2160_v27, %v1122_v2 }
 0x13e   : > { %1177 = vst.msk [vmem:[%s2163_s26 + $0x88] sm:$0xff] %vm558_vm0, %v1123_v3 }
 0x13f   : > { %v1087_v4 = vpop.f32.mrf.mxu1 }
 0x140   : > { %v1088_v5 = vadd.f32 %v2160_v27, %v1087_v4 }
 0x142   : > { %1163 = vst.msk [vmem:[%s2163_s26 + $0x18] sm:$0xff] %vm558_vm0, %v1088_v5 }
 0x143   : > { %v1125_v6 = vpop.f32.mrf.mxu3 }
 0x144   : > { %v1126_v7 = vadd.f32 %v2160_v27, %v1125_v6 }
 0x146   : > { %1178 = vst.msk [vmem:[%s2163_s26 + $0x90] sm:$0xff] %vm558_vm0, %v1126_v7 }
 0x147   : > { %v1090_v8 = vpop.f32.mrf.mxu1 }
 0x148   : > { %v1091_v9 = vadd.f32 %v2160_v27, %v1090_v8 }
 0x14a   : > { %1164 = vst.msk [vmem:[%s2163_s26 + $0x20] sm:$0xff] %vm558_vm0, %v1091_v9 }
 0x14b   : > { %v1127_v10 = vpop.f32.mrf.mxu3 }
 0x14c   : > { %v1128_v11 = vadd.f32 %v2160_v27, %v1127_v10 }
 0x14e   : > { %1179 = vst.msk [vmem:[%s2163_s26 + $0x98] sm:$0xff] %vm558_vm0, %v1128_v11 }
 0x14f   : > { %v1092_v12 = vpop.f32.mrf.mxu1 }
 0x150   : > { %v1093_v13 = vadd.f32 %v2160_v27, %v1092_v12 }
 0x152   : > { %1165 = vst.msk [vmem:[%s2163_s26 + $0x28] sm:$0xff] %vm558_vm0, %v1093_v13 }
 0x153   : > { %v1130_v14 = vpop.f32.mrf.mxu3 }
 0x154   : > { %v1131_v15 = vadd.f32 %v2160_v27, %v1130_v14 }
 0x156   : > { %1180 = vst.msk [vmem:[%s2163_s26 + $0xa0] sm:$0xff] %vm558_vm0, %v1131_v15 }
 0x157   : > { %v1095_v16 = vpop.f32.mrf.mxu1 }
 0x158   : > { %v1096_v17 = vadd.f32 %v2160_v27, %v1095_v16 }
 0x15a   : > { %1166 = vst.msk [vmem:[%s2163_s26 + $0x30] sm:$0xff] %vm558_vm0, %v1096_v17 }
 0x15b   : > { %v1132_v18 = vpop.f32.mrf.mxu3 }
 0x15c   : > { %v1133_v19 = vadd.f32 %v2160_v27, %v1132_v18 }
 0x15e   : > { %1181 = vst.msk [vmem:[%s2163_s26 + $0xa8] sm:$0xff] %vm558_vm0, %v1133_v19 }
 0x15f   : > { %v1097_v20 = vpop.f32.mrf.mxu1 }
 0x160   : > { %v1098_v21 = vadd.f32 %v2160_v27, %v1097_v20 }
 0x162   : > { %1167 = vst.msk [vmem:[%s2163_s26 + $0x38] sm:$0xff] %vm558_vm0, %v1098_v21 }
 0x163   : > { %v1135_v22 = vpop.f32.mrf.mxu3 }
 0x164   : > { %v1136_v23 = vadd.f32 %v2160_v27, %v1135_v22 }
 0x166   : > { %1182 = vst.msk [vmem:[%s2163_s26 + $0xb0] sm:$0xff] %vm558_vm0, %v1136_v23 }
 0x167   : > { %v1100_v24 = vpop.f32.mrf.mxu1 }
 0x168   : > { %v1101_v25 = vadd.f32 %v2160_v27, %v1100_v24 }
 0x16a   : > { %1168 = vst.msk [vmem:[%s2163_s26 + $0x40] sm:$0xff] %vm558_vm0, %v1101_v25 }
 0x16b   : > { %v1137_v29 = vpop.f32.mrf.mxu3 }
 0x16c   : > { %v1138_v30 = vadd.f32 %v2160_v27, %v1137_v29 }
 0x16e   : > { %1183 = vst.msk [vmem:[%s2163_s26 + $0xb8] sm:$0xff] %vm558_vm0, %v1138_v30 }
 0x16f   : > { %v1102_v31 = vpop.f32.mrf.mxu1 }
 0x170   : > { %v1103_v32 = vadd.f32 %v2160_v27, %v1102_v31 }
 0x172   : > { %1169 = vst.msk [vmem:[%s2163_s26 + $0x48] sm:$0xff] %vm558_vm0, %v1103_v32 }
 0x173   : > { %v1140_v33 = vpop.f32.mrf.mxu3 }
 0x174   : > { %v1141_v34 = vadd.f32 %v2160_v27, %v1140_v33 }
 0x176   : > { %1184 = vst.msk [vmem:[%s2163_s26 + $0xc0] sm:$0xff] %vm558_vm0, %v1141_v34 }
 0x177   : > { %v1105_v35 = vpop.f32.mrf.mxu1 }
 0x178   : > { %v1106_v37 = vadd.f32 %v2160_v27, %v1105_v35 }
 0x17a   : > { %1170 = vst.msk [vmem:[%s2163_s26 + $0x50] sm:$0xff] %vm558_vm0, %v1106_v37 }
 0x17b   : > { %v1142_v38 = vpop.f32.mrf.mxu3 }
 0x17c   : > { %v1143_v39 = vadd.f32 %v2160_v27, %v1142_v38 }
 0x17e   : > { %1185 = vst.msk [vmem:[%s2163_s26 + $0xc8] sm:$0xff] %vm558_vm0, %v1143_v39 }
 0x17f   : > { %v1107_v40 = vpop.f32.mrf.mxu1 }
 0x180   : > { %v1108_v41 = vadd.f32 %v2160_v27, %v1107_v40 }
 0x182   : > { %1171 = vst.msk [vmem:[%s2163_s26 + $0x58] sm:$0xff] %vm558_vm0, %v1108_v41 }
 0x183   : > { %v1145_v42 = vpop.f32.mrf.mxu3 }
 0x184   : > { %v1146_v43 = vadd.f32 %v2160_v27, %v1145_v42 }
 0x186   : > { %1186 = vst.msk [vmem:[%s2163_s26 + $0xd0] sm:$0xff] %vm558_vm0, %v1146_v43 }
 0x187   : > { %v1110_v44 = vpop.f32.mrf.mxu1 }
 0x188   : > { %v1111_v45 = vadd.f32 %v2160_v27, %v1110_v44 }
 0x18a   : > { %1172 = vst.msk [vmem:[%s2163_s26 + $0x60] sm:$0xff] %vm558_vm0, %v1111_v45 }
 0x18b   : > { %v1147_v46 = vpop.f32.mrf.mxu3 }
 0x18c   : > { %v1148_v47 = vadd.f32 %v2160_v27, %v1147_v46 }
 0x18e   : > { %1187 = vst.msk [vmem:[%s2163_s26 + $0xd8] sm:$0xff] %vm558_vm0, %v1148_v47 }
 0x18f   : > { %v1112_v48 = vpop.f32.mrf.mxu1 }
 0x190   : > { %v1113_v49 = vadd.f32 %v2160_v27, %v1112_v48 }
 0x192   : > { %1173 = vst.msk [vmem:[%s2163_s26 + $0x68] sm:$0xff] %vm558_vm0, %v1113_v49 }
 0x193   : > { %v1150_v50 = vpop.f32.mrf.mxu3 }
 0x194   : > { %v1151_v51 = vadd.f32 %v2160_v27, %v1150_v50 }
 0x196   : > { %1188 = vst.msk [vmem:[%s2163_s26 + $0xe0] sm:$0xff] %vm558_vm0, %v1151_v51 }
 0x197   : > { %v1115_v52 = vpop.f32.mrf.mxu1 }
 0x198   : > { %v1116_v53 = vadd.f32 %v2160_v27, %v1115_v52 }
 0x19a   : > { %1174 = vst.msk [vmem:[%s2163_s26 + $0x70] sm:$0xff] %vm558_vm0, %v1116_v53 }
 0x19b   : > { %v1152_v54 = vpop.f32.mrf.mxu3 }
 0x19c   : > { %v1153_v55 = vadd.f32 %v2160_v27, %v1152_v54 }
 0x19e   : > { %1189 = vst.msk [vmem:[%s2163_s26 + $0xe8] sm:$0xff] %vm558_vm0, %v1153_v55 }
 0x19f   : > { %v1117_v56 = vpop.f32.mrf.mxu1 }
 0x1a0   : > { %v1118_v26 = vadd.f32 %v2160_v27, %v1117_v56 }
 0x1a2   : > { %1175 = vst.msk [vmem:[%s2163_s26 + $0x78] sm:$0xff] %vm558_vm0, %v1118_v26 }
 0x1a3   : > { %v1155_v57 = vpop.f32.mrf.mxu3 }
 0x1a4   : > { %v1156_v58 = vadd.f32 %v2160_v27, %v1155_v57 }
 0x1a6   : > { %1190 = vst.msk [vmem:[%s2163_s26 + $0xf0] sm:$0xff] %vm558_vm0, %v1156_v58 }
 0x1ab   : > { %v1157_v59 = vpop.f32.mrf.mxu3 }
 0x1ac   : > { %v1158_v28 = vadd.f32 %v2160_v27, %v1157_v59 }
 0x1ae   : > { %1191 = vst.msk [vmem:[%s2163_s26 + $0xf8] sm:$0xff] %vm558_vm0, %v1158_v28 }
 0x1af   : > { %1739 = shalt.err (!%p1736_p5)
}
 0x1b0   : > { %s1792_s24 = smov 128   ;;  %s1793_s26 = smov 8  }
 0x1b1   : > { %1653 = dma.vmem_to_hbm [thread:$0]  (%p1879_p4), %s1208_s11, 4096, %s1210_s23, %s1193_s30, %s1792_s24, %s1792_s24, %s1793_s26  }
 0x1b2 PF: > { %p1659_p6 = scmp.ge.s32.totalorder %s1790_s10, 2  ;;  %s1224_s19 = sand.u32 1, %s1770_s27  }
 0x1b3   : > { %s1225_s22 = scalar_lea.sflag [#allocation3], %s1224_s19 }
 0x1b4   : > { %p1656_p7 = pnand %p1659_p6, %p1886_p8 }
 0x1b6   : > { %p1657_p9 = pneg %p1656_p7 }
 0x1b8   : > { %1765 = dma.done.wait (%p1657_p9), %s1225_s22, 4096  }
 0x1b9   : > { %1767 = vsyncadd (%p1657_p9), %s1225_s22, 4294963200  ;;  %s21_s10 = sadd.s32 1, %s1790_s10   ;;  %s2310_s27 = smov %s1774_s28 }
 0x1ba   : > { %p18_p10 = scmp.ge.s32.totalorder %s21_s10, 4   ;;  %s2311_s28 = smov %s1778_s29 }
 0x1bb   : > { %s2312_s29 = smov %s1892_s18  ;;  %s2313_s30 = smov %s1786_s9 }
 0x1bc   : > { %s2314_s9 = smov %s2316_s13  ;;  %20 = sbr.rel (!%p18_p10) target bundleno = 4 (0x4), region = 96 }
 0x1c1   :  { %1231 = vsyncpa [#allocation3], 1 }
 0x1c2   :  { %1233 = vsyncpa [#allocation3 + $0x1], 1 }

</bundles_post_ra>
